<compile_context>
chip_gen: v5e
topology: v5e:2x2
jax: 0.10.0
libtpu: 0.0.40
codegen_flags: <defaults>
</compile_context>

<pallas_src>
import functools

import jax
import jax.numpy as jnp
from jax.experimental import pallas as pl
from jax.experimental.pallas import tpu as pltpu

# ---------------- model hyper-parameters (small, synthetic) ----------------
BATCH = 2
SEQ = 8
INPUT_DIM = 4
HIDDEN_DIM = 32
NUM_LAYERS = 2
OUTPUT_DIM = 1


# ------------------------------ Pallas kernel ------------------------------
def _lstm_kernel(num_layers, seq_len, hidden_dim, *refs):
    """All LSTM layers + final FC in one kernel invocation.

    refs = (x_ref,                               # (B, T, D_in) raw, batch-first
            [wih_T, whh_T, bias] * num_layers,   # (D_in,4H), (H,4H), (1,4H)
            wfc, bfc,                            # (O, H), (1, O)
            out_ref,                             # (B, O)
            pre_scratch)                         # (T, B, 4H) VMEM scratch
    """
    H = hidden_dim
    T = seq_len
    n_w = 3 * num_layers
    x_ref = refs[0]
    w_refs = refs[1:1 + n_w]
    wfc_ref = refs[1 + n_w]
    bfc_ref = refs[2 + n_w]
    out_ref = refs[3 + n_w]
    pre_ref = refs[4 + n_w]

    B = x_ref.shape[0]
    D = x_ref.shape[2]
    cdt = jnp.bfloat16  # MXU operand dtype on the serial recurrence path

    # ---- layer-0 input projection, hoisted: one (B*T, D) x (D, 4H) GEMM ----
    # reshape only collapses leading dims (last/lane dim unchanged) -> layout
    # preserving; pre0 is kept as a (B, T, 4H) value (2 vregs at these sizes).
    x2d = x_ref[...].reshape(B * T, D)
    pre0 = (
        jnp.dot(x2d, w_refs[0][...], preferred_element_type=jnp.float32)
        + w_refs[2][...]
    ).reshape(B, T, 4 * H)

    h = None
    for layer in range(num_layers):
        # W_hh is loop-invariant over T: load + bf16-cast once per layer.
        whh = w_refs[3 * layer + 1][...].astype(cdt)              # (H, 4H)
        last_layer = (layer + 1 == num_layers)
        if not last_layer:
            wih_nxt = w_refs[3 * (layer + 1)][...]                # (H, 4H) f32
            b_nxt = w_refs[3 * (layer + 1) + 2][...]              # (1, 4H)

        # h0 = c0 = 0 (matches torch.zeros in forward()); carried in vregs.
        h = jnp.zeros((B, H), jnp.float32)
        c = jnp.zeros((B, H), jnp.float32)
        for t in range(T):
            if layer == 0:
                g_in = pre0[:, t, :]                              # (B, 4H)
            else:
                g_in = pre_ref[t]                                 # (B, 4H) vld
            # Serial critical path: single bf16 MXU pass per step, f32 accum.
            gates = g_in + jnp.dot(h.astype(cdt), whh,
                                   preferred_element_type=jnp.float32)

            # Full-width transcendentals (one EUP push each), then column picks.
            sig = jax.nn.sigmoid(gates)
            th = jnp.tanh(gates)
            i_g = sig[:, 0 * H:1 * H]
            f_g = sig[:, 1 * H:2 * H]
            g_g = th[:, 2 * H:3 * H]
            o_g = sig[:, 3 * H:4 * H]

            c = f_g * c + i_g * g_g
            h = o_g * jnp.tanh(c)

            if not last_layer:
                # Interleaved next-layer input projection: off the h->h
                # critical path, fills the idle MXU slot; stored to VMEM
                # scratch (vst), next layer only does one cheap vld per step.
                pre_ref[t] = (
                    jnp.dot(h, wih_nxt, preferred_element_type=jnp.float32)
                    + b_nxt
                )

    # ---- fc(out[:, -1, :]) : last layer's hidden state at final timestep ----
    wfc = wfc_ref[...]                                            # (O, H)
    bfc = bfc_ref[...]                                            # (1, O)
    if wfc.shape[0] == 1:
        # Degenerate N=1 matmul -> VPU multiply + lane reduction (no MXU drain).
        out_ref[...] = jnp.sum(h * wfc, axis=-1, keepdims=True) + bfc
    else:
        out_ref[...] = jax.lax.dot_general(
            h, wfc, (((1,), (1,)), ((), ())),
            preferred_element_type=jnp.float32) + bfc


# ------------------------------ wrapper ------------------------------------
def prepare_params(params):
    """One-time weight layout prep (pre-transpose, fold biases). Not per-call."""
    H = HIDDEN_DIM
    O = OUTPUT_DIM
    prepped = []
    for l in range(NUM_LAYERS):
        w_ih = params[f"w_ih_{l}"]                                # (4H, D_in)
        w_hh = params[f"w_hh_{l}"]                                # (4H, H)
        b = params[f"b_ih_{l}"] + params[f"b_hh_{l}"]             # (4H,)
        prepped += [w_ih.T, w_hh.T, b.reshape(1, 4 * H)]
    prepped += [params["w_fc"].reshape(O, H), params["b_fc"].reshape(1, O)]
    return [jnp.asarray(p, jnp.float32) for p in prepped]


def lstm_model_forward(x, prepped_params):
    """x: (B, T, D) float32, prepped_params: output of prepare_params()."""
    B, T, _ = x.shape
    H = HIDDEN_DIM
    O = OUTPUT_DIM

    vmem = pl.BlockSpec(memory_space=pltpu.MemorySpace.VMEM)
    kernel = functools.partial(_lstm_kernel, NUM_LAYERS, T, H)

    # Single grid-less call: whole problem fits trivially in VMEM.  A
    # "parallel" grid axis over independent sequences would shard across v7x's
    # 2 TensorCores when serving many sequences.
    return pl.pallas_call(
        kernel,
        out_shape=jax.ShapeDtypeStruct((B, O), jnp.float32),
        in_specs=[vmem] * (1 + len(prepped_params)),
        out_specs=vmem,
        scratch_shapes=[pltpu.VMEM((T, B, 4 * H), jnp.float32)],
        compiler_params=pltpu.CompilerParams(
            # Trivial at these sizes; declared so a scaled-up config does not
            # silently overshoot v7x's smaller 64 MiB physical VMEM.
            vmem_limit_bytes=32 * 1024 * 1024,
        ),
    )(x.astype(jnp.float32), *prepped_params)


# --------------------------- pure-JAX reference -----------------------------
def lstm_model_reference(x, params):
    B, T, D = x.shape
    H = HIDDEN_DIM
    seq = x.astype(jnp.float32)
    for l in range(NUM_LAYERS):
        w_ih = params[f"w_ih_{l}"]
        w_hh = params[f"w_hh_{l}"]
        b = params[f"b_ih_{l}"] + params[f"b_hh_{l}"]
        h = jnp.zeros((B, H), jnp.float32)
        c = jnp.zeros((B, H), jnp.float32)
        outs = []
        for t in range(T):
            gates = seq[:, t, :] @ w_ih.T + h @ w_hh.T + b
            i_g = jax.nn.sigmoid(gates[:, 0 * H:1 * H])
            f_g = jax.nn.sigmoid(gates[:, 1 * H:2 * H])
            g_g = jnp.tanh(gates[:, 2 * H:3 * H])
            o_g = jax.nn.sigmoid(gates[:, 3 * H:4 * H])
            c = f_g * c + i_g * g_g
            h = o_g * jnp.tanh(c)
            outs.append(h)
        seq = jnp.stack(outs, axis=1)
    return seq[:, -1, :] @ params["w_fc"].T + params["b_fc"]


# ------------------------ deterministic param init --------------------------
def init_params(key):
    params = {}
    H = HIDDEN_DIM
    k = 1.0 / jnp.sqrt(H)
    for l in range(NUM_LAYERS):
        d_in = INPUT_DIM if l == 0 else H
        key, k1, k2, k3, k4 = jax.random.split(key, 5)
        params[f"w_ih_{l}"] = jax.random.uniform(k1, (4 * H, d_in), jnp.float32, -k, k)
        params[f"w_hh_{l}"] = jax.random.uniform(k2, (4 * H, H), jnp.float32, -k, k)
        params[f"b_ih_{l}"] = jax.random.uniform(k3, (4 * H,), jnp.float32, -k, k)
        params[f"b_hh_{l}"] = jax.random.uniform(k4, (4 * H,), jnp.float32, -k, k)
    key, k5, k6 = jax.random.split(key, 3)
    params["w_fc"] = jax.random.uniform(k5, (OUTPUT_DIM, H), jnp.float32, -k, k)
    params["b_fc"] = jax.random.uniform(k6, (OUTPUT_DIM,), jnp.float32, -k, k)
    return params


if __name__ == "__main__":
    root = jax.random.PRNGKey(0)
    k_x, k_p = jax.random.split(root)

    x = jax.random.normal(k_x, (BATCH, SEQ, INPUT_DIM), jnp.float32)
    params = init_params(k_p)
    prepped = prepare_params(params)  # one-time weight layout prep

    out = jax.block_until_ready(lstm_model_forward(x, prepped))
    ref = jax.block_until_ready(lstm_model_reference(x, params))

    assert out.shape == (BATCH, OUTPUT_DIM), out.shape
    # bf16 operands on the recurrence matmul (f32 accumulate) change the
    # trajectory slightly vs the f32 reference -> loosened tolerance.
    assert jnp.allclose(out, ref, atol=3e-2, rtol=1e-2), (out, ref)
    print("KERNEL_OK")
</pallas_src>

<mosaic_0001>
module attributes {stable_mosaic.version = 11 : i64} {
  func.func @_lstm_kernel(%arg0: memref<2x8x4xf32, #tpu.memory_space<vmem>>, %arg1: memref<4x128xf32, #tpu.memory_space<vmem>>, %arg2: memref<32x128xf32, #tpu.memory_space<vmem>>, %arg3: memref<1x128xf32, #tpu.memory_space<vmem>>, %arg4: memref<32x128xf32, #tpu.memory_space<vmem>>, %arg5: memref<32x128xf32, #tpu.memory_space<vmem>>, %arg6: memref<1x128xf32, #tpu.memory_space<vmem>>, %arg7: memref<1x32xf32, #tpu.memory_space<vmem>>, %arg8: memref<1x1xf32, #tpu.memory_space<vmem>>, %arg9: memref<2x1xf32, #tpu.memory_space<vmem>>, %arg10: memref<8x2x128xf32, #tpu.memory_space<vmem>>) attributes {dimension_semantics = [], scalar_prefetch = 0 : i64, scratch_operands = 1 : i64, tpu.core_type = #tpu.core_type<tc>} {
    %c0 = arith.constant 0 : index
    %c0_0 = arith.constant 0 : index
    %c0_1 = arith.constant 0 : index
    %0 = vector.load %arg0[%c0, %c0_0, %c0_1] : memref<2x8x4xf32, #tpu.memory_space<vmem>>, vector<2x8x4xf32>
    %1 = vector.shape_cast %0 : vector<2x8x4xf32> to vector<16x4xf32>
    %c0_2 = arith.constant 0 : index
    %c0_3 = arith.constant 0 : index
    %2 = vector.load %arg1[%c0_2, %c0_3] : memref<4x128xf32, #tpu.memory_space<vmem>>, vector<4x128xf32>
    %cst = arith.constant dense<0.000000e+00> : vector<16x128xf32>
    %3 = tpu.matmul %1, %2, %cst {dimension_numbers = #tpu.dot_dimension_numbers<[1], [0], [0], [1], [0, 0, 1, 1], [], []>} : vector<16x4xf32>, vector<4x128xf32>, vector<16x128xf32> -> vector<16x128xf32>
    %c0_4 = arith.constant 0 : index
    %c0_5 = arith.constant 0 : index
    %4 = vector.load %arg3[%c0_4, %c0_5] : memref<1x128xf32, #tpu.memory_space<vmem>>, vector<1x128xf32>
    %5 = vector.broadcast %4 : vector<1x128xf32> to vector<16x128xf32>
    %6 = arith.addf %3, %5 : vector<16x128xf32>
    %7 = vector.shape_cast %6 : vector<16x128xf32> to vector<2x8x128xf32>
    %c0_6 = arith.constant 0 : index
    %c0_7 = arith.constant 0 : index
    %8 = vector.load %arg2[%c0_6, %c0_7] : memref<32x128xf32, #tpu.memory_space<vmem>>, vector<32x128xf32>
    %9 = arith.truncf %8 : vector<32x128xf32> to vector<32x128xbf16>
    %c0_8 = arith.constant 0 : index
    %c0_9 = arith.constant 0 : index
    %10 = vector.load %arg4[%c0_8, %c0_9] : memref<32x128xf32, #tpu.memory_space<vmem>>, vector<32x128xf32>
    %c0_10 = arith.constant 0 : index
    %c0_11 = arith.constant 0 : index
    %11 = vector.load %arg6[%c0_10, %c0_11] : memref<1x128xf32, #tpu.memory_space<vmem>>, vector<1x128xf32>
    %cst_12 = arith.constant 0.000000e+00 : f32
    %12 = vector.broadcast %cst_12 : f32 to vector<2x32xf32>
    %cst_13 = arith.constant 0.000000e+00 : f32
    %13 = vector.broadcast %cst_13 : f32 to vector<2x32xf32>
    %14 = vector.extract_strided_slice %7 {offsets = [0, 0, 0], sizes = [2, 1, 128], strides = [1, 1, 1]} : vector<2x8x128xf32> to vector<2x1x128xf32>
    %15 = vector.shape_cast %14 : vector<2x1x128xf32> to vector<2x128xf32>
    %16 = arith.truncf %12 : vector<2x32xf32> to vector<2x32xbf16>
    %cst_14 = arith.constant dense<0.000000e+00> : vector<2x128xf32>
    %17 = tpu.matmul %16, %9, %cst_14 {dimension_numbers = #tpu.dot_dimension_numbers<[1], [0], [0], [1], [0, 0, 1, 1], [], []>} : vector<2x32xbf16>, vector<32x128xbf16>, vector<2x128xf32> -> vector<2x128xf32>
    %18 = arith.addf %15, %17 : vector<2x128xf32>
    %19 = arith.negf %18 : vector<2x128xf32>
    %20 = math.exp %19 : vector<2x128xf32>
    %cst_15 = arith.constant 1.000000e+00 : f32
    %21 = vector.broadcast %cst_15 : f32 to vector<2x128xf32>
    %22 = arith.addf %21, %20 : vector<2x128xf32>
    %23 = arith.divf %21, %22 : vector<2x128xf32>
    %24 = math.tanh %18 : vector<2x128xf32>
    %25 = vector.extract_strided_slice %23 {offsets = [0, 0], sizes = [2, 32], strides = [1, 1]} : vector<2x128xf32> to vector<2x32xf32>
    %26 = vector.extract_strided_slice %23 {offsets = [0, 32], sizes = [2, 32], strides = [1, 1]} : vector<2x128xf32> to vector<2x32xf32>
    %27 = vector.extract_strided_slice %24 {offsets = [0, 64], sizes = [2, 32], strides = [1, 1]} : vector<2x128xf32> to vector<2x32xf32>
    %28 = vector.extract_strided_slice %23 {offsets = [0, 96], sizes = [2, 32], strides = [1, 1]} : vector<2x128xf32> to vector<2x32xf32>
    %29 = arith.mulf %26, %13 : vector<2x32xf32>
    %30 = arith.mulf %25, %27 : vector<2x32xf32>
    %31 = arith.addf %29, %30 : vector<2x32xf32>
    %32 = math.tanh %31 : vector<2x32xf32>
    %33 = arith.mulf %28, %32 : vector<2x32xf32>
    %cst_16 = arith.constant dense<0.000000e+00> : vector<2x128xf32>
    %34 = tpu.matmul %33, %10, %cst_16 {dimension_numbers = #tpu.dot_dimension_numbers<[1], [0], [0], [1], [0, 0, 1, 1], [], []>} : vector<2x32xf32>, vector<32x128xf32>, vector<2x128xf32> -> vector<2x128xf32>
    %35 = vector.broadcast %11 : vector<1x128xf32> to vector<2x128xf32>
    %36 = arith.addf %34, %35 : vector<2x128xf32>
    %c0_17 = arith.constant 0 : index
    %c0_18 = arith.constant 0 : index
    %c0_19 = arith.constant 0 : index
    %37 = vector.load %arg10[%c0_17, %c0_18, %c0_19] : memref<8x2x128xf32, #tpu.memory_space<vmem>>, vector<1x2x128xf32>
    %38 = vector.shape_cast %37 : vector<1x2x128xf32> to vector<2x128xf32>
    %39 = vector.shape_cast %36 : vector<2x128xf32> to vector<1x2x128xf32>
    tpu.vector_store %arg10[%c0_17, %c0_18, %c0_19], %39 {strides = array<i32>} : memref<8x2x128xf32, #tpu.memory_space<vmem>>, vector<1x2x128xf32>,
    %40 = vector.extract_strided_slice %7 {offsets = [0, 1, 0], sizes = [2, 1, 128], strides = [1, 1, 1]} : vector<2x8x128xf32> to vector<2x1x128xf32>
    %41 = vector.shape_cast %40 : vector<2x1x128xf32> to vector<2x128xf32>
    %42 = arith.truncf %33 : vector<2x32xf32> to vector<2x32xbf16>
    %cst_20 = arith.constant dense<0.000000e+00> : vector<2x128xf32>
    %43 = tpu.matmul %42, %9, %cst_20 {dimension_numbers = #tpu.dot_dimension_numbers<[1], [0], [0], [1], [0, 0, 1, 1], [], []>} : vector<2x32xbf16>, vector<32x128xbf16>, vector<2x128xf32> -> vector<2x128xf32>
    %44 = arith.addf %41, %43 : vector<2x128xf32>
    %45 = arith.negf %44 : vector<2x128xf32>
    %46 = math.exp %45 : vector<2x128xf32>
    %cst_21 = arith.constant 1.000000e+00 : f32
    %47 = vector.broadcast %cst_21 : f32 to vector<2x128xf32>
    %48 = arith.addf %47, %46 : vector<2x128xf32>
    %49 = arith.divf %47, %48 : vector<2x128xf32>
    %50 = math.tanh %44 : vector<2x128xf32>
    %51 = vector.extract_strided_slice %49 {offsets = [0, 0], sizes = [2, 32], strides = [1, 1]} : vector<2x128xf32> to vector<2x32xf32>
    %52 = vector.extract_strided_slice %49 {offsets = [0, 32], sizes = [2, 32], strides = [1, 1]} : vector<2x128xf32> to vector<2x32xf32>
    %53 = vector.extract_strided_slice %50 {offsets = [0, 64], sizes = [2, 32], strides = [1, 1]} : vector<2x128xf32> to vector<2x32xf32>
    %54 = vector.extract_strided_slice %49 {offsets = [0, 96], sizes = [2, 32], strides = [1, 1]} : vector<2x128xf32> to vector<2x32xf32>
    %55 = arith.mulf %52, %31 : vector<2x32xf32>
    %56 = arith.mulf %51, %53 : vector<2x32xf32>
    %57 = arith.addf %55, %56 : vector<2x32xf32>
    %58 = math.tanh %57 : vector<2x32xf32>
    %59 = arith.mulf %54, %58 : vector<2x32xf32>
    %cst_22 = arith.constant dense<0.000000e+00> : vector<2x128xf32>
    %60 = tpu.matmul %59, %10, %cst_22 {dimension_numbers = #tpu.dot_dimension_numbers<[1], [0], [0], [1], [0, 0, 1, 1], [], []>} : vector<2x32xf32>, vector<32x128xf32>, vector<2x128xf32> -> vector<2x128xf32>
    %61 = vector.broadcast %11 : vector<1x128xf32> to vector<2x128xf32>
    %62 = arith.addf %60, %61 : vector<2x128xf32>
    %c1 = arith.constant 1 : index
    %c0_23 = arith.constant 0 : index
    %c0_24 = arith.constant 0 : index
    %63 = vector.load %arg10[%c1, %c0_23, %c0_24] : memref<8x2x128xf32, #tpu.memory_space<vmem>>, vector<1x2x128xf32>
    %64 = vector.shape_cast %63 : vector<1x2x128xf32> to vector<2x128xf32>
    %65 = vector.shape_cast %62 : vector<2x128xf32> to vector<1x2x128xf32>
    tpu.vector_store %arg10[%c1, %c0_23, %c0_24], %65 {strides = array<i32>} : memref<8x2x128xf32, #tpu.memory_space<vmem>>, vector<1x2x128xf32>,
    %66 = vector.extract_strided_slice %7 {offsets = [0, 2, 0], sizes = [2, 1, 128], strides = [1, 1, 1]} : vector<2x8x128xf32> to vector<2x1x128xf32>
    %67 = vector.shape_cast %66 : vector<2x1x128xf32> to vector<2x128xf32>
    %68 = arith.truncf %59 : vector<2x32xf32> to vector<2x32xbf16>
    %cst_25 = arith.constant dense<0.000000e+00> : vector<2x128xf32>
    %69 = tpu.matmul %68, %9, %cst_25 {dimension_numbers = #tpu.dot_dimension_numbers<[1], [0], [0], [1], [0, 0, 1, 1], [], []>} : vector<2x32xbf16>, vector<32x128xbf16>, vector<2x128xf32> -> vector<2x128xf32>
    %70 = arith.addf %67, %69 : vector<2x128xf32>
    %71 = arith.negf %70 : vector<2x128xf32>
    %72 = math.exp %71 : vector<2x128xf32>
    %cst_26 = arith.constant 1.000000e+00 : f32
    %73 = vector.broadcast %cst_26 : f32 to vector<2x128xf32>
    %74 = arith.addf %73, %72 : vector<2x128xf32>
    %75 = arith.divf %73, %74 : vector<2x128xf32>
    %76 = math.tanh %70 : vector<2x128xf32>
    %77 = vector.extract_strided_slice %75 {offsets = [0, 0], sizes = [2, 32], strides = [1, 1]} : vector<2x128xf32> to vector<2x32xf32>
    %78 = vector.extract_strided_slice %75 {offsets = [0, 32], sizes = [2, 32], strides = [1, 1]} : vector<2x128xf32> to vector<2x32xf32>
    %79 = vector.extract_strided_slice %76 {offsets = [0, 64], sizes = [2, 32], strides = [1, 1]} : vector<2x128xf32> to vector<2x32xf32>
    %80 = vector.extract_strided_slice %75 {offsets = [0, 96], sizes = [2, 32], strides = [1, 1]} : vector<2x128xf32> to vector<2x32xf32>
    %81 = arith.mulf %78, %57 : vector<2x32xf32>
    %82 = arith.mulf %77, %79 : vector<2x32xf32>
    %83 = arith.addf %81, %82 : vector<2x32xf32>
    %84 = math.tanh %83 : vector<2x32xf32>
    %85 = arith.mulf %80, %84 : vector<2x32xf32>
    %cst_27 = arith.constant dense<0.000000e+00> : vector<2x128xf32>
    %86 = tpu.matmul %85, %10, %cst_27 {dimension_numbers = #tpu.dot_dimension_numbers<[1], [0], [0], [1], [0, 0, 1, 1], [], []>} : vector<2x32xf32>, vector<32x128xf32>, vector<2x128xf32> -> vector<2x128xf32>
    %87 = vector.broadcast %11 : vector<1x128xf32> to vector<2x128xf32>
    %88 = arith.addf %86, %87 : vector<2x128xf32>
    %c2 = arith.constant 2 : index
    %c0_28 = arith.constant 0 : index
    %c0_29 = arith.constant 0 : index
    %89 = vector.load %arg10[%c2, %c0_28, %c0_29] : memref<8x2x128xf32, #tpu.memory_space<vmem>>, vector<1x2x128xf32>
    %90 = vector.shape_cast %89 : vector<1x2x128xf32> to vector<2x128xf32>
    %91 = vector.shape_cast %88 : vector<2x128xf32> to vector<1x2x128xf32>
    tpu.vector_store %arg10[%c2, %c0_28, %c0_29], %91 {strides = array<i32>} : memref<8x2x128xf32, #tpu.memory_space<vmem>>, vector<1x2x128xf32>,
    %92 = vector.extract_strided_slice %7 {offsets = [0, 3, 0], sizes = [2, 1, 128], strides = [1, 1, 1]} : vector<2x8x128xf32> to vector<2x1x128xf32>
    %93 = vector.shape_cast %92 : vector<2x1x128xf32> to vector<2x128xf32>
    %94 = arith.truncf %85 : vector<2x32xf32> to vector<2x32xbf16>
    %cst_30 = arith.constant dense<0.000000e+00> : vector<2x128xf32>
    %95 = tpu.matmul %94, %9, %cst_30 {dimension_numbers = #tpu.dot_dimension_numbers<[1], [0], [0], [1], [0, 0, 1, 1], [], []>} : vector<2x32xbf16>, vector<32x128xbf16>, vector<2x128xf32> -> vector<2x128xf32>
    %96 = arith.addf %93, %95 : vector<2x128xf32>
    %97 = arith.negf %96 : vector<2x128xf32>
    %98 = math.exp %97 : vector<2x128xf32>
    %cst_31 = arith.constant 1.000000e+00 : f32
    %99 = vector.broadcast %cst_31 : f32 to vector<2x128xf32>
    %100 = arith.addf %99, %98 : vector<2x128xf32>
    %101 = arith.divf %99, %100 : vector<2x128xf32>
    %102 = math.tanh %96 : vector<2x128xf32>
    %103 = vector.extract_strided_slice %101 {offsets = [0, 0], sizes = [2, 32], strides = [1, 1]} : vector<2x128xf32> to vector<2x32xf32>
    %104 = vector.extract_strided_slice %101 {offsets = [0, 32], sizes = [2, 32], strides = [1, 1]} : vector<2x128xf32> to vector<2x32xf32>
    %105 = vector.extract_strided_slice %102 {offsets = [0, 64], sizes = [2, 32], strides = [1, 1]} : vector<2x128xf32> to vector<2x32xf32>
    %106 = vector.extract_strided_slice %101 {offsets = [0, 96], sizes = [2, 32], strides = [1, 1]} : vector<2x128xf32> to vector<2x32xf32>
    %107 = arith.mulf %104, %83 : vector<2x32xf32>
    %108 = arith.mulf %103, %105 : vector<2x32xf32>
    %109 = arith.addf %107, %108 : vector<2x32xf32>
    %110 = math.tanh %109 : vector<2x32xf32>
    %111 = arith.mulf %106, %110 : vector<2x32xf32>
    %cst_32 = arith.constant dense<0.000000e+00> : vector<2x128xf32>
    %112 = tpu.matmul %111, %10, %cst_32 {dimension_numbers = #tpu.dot_dimension_numbers<[1], [0], [0], [1], [0, 0, 1, 1], [], []>} : vector<2x32xf32>, vector<32x128xf32>, vector<2x128xf32> -> vector<2x128xf32>
    %113 = vector.broadcast %11 : vector<1x128xf32> to vector<2x128xf32>
    %114 = arith.addf %112, %113 : vector<2x128xf32>
    %c3 = arith.constant 3 : index
    %c0_33 = arith.constant 0 : index
    %c0_34 = arith.constant 0 : index
    %115 = vector.load %arg10[%c3, %c0_33, %c0_34] : memref<8x2x128xf32, #tpu.memory_space<vmem>>, vector<1x2x128xf32>
    %116 = vector.shape_cast %115 : vector<1x2x128xf32> to vector<2x128xf32>
    %117 = vector.shape_cast %114 : vector<2x128xf32> to vector<1x2x128xf32>
    tpu.vector_store %arg10[%c3, %c0_33, %c0_34], %117 {strides = array<i32>} : memref<8x2x128xf32, #tpu.memory_space<vmem>>, vector<1x2x128xf32>,
    %118 = vector.extract_strided_slice %7 {offsets = [0, 4, 0], sizes = [2, 1, 128], strides = [1, 1, 1]} : vector<2x8x128xf32> to vector<2x1x128xf32>
    %119 = vector.shape_cast %118 : vector<2x1x128xf32> to vector<2x128xf32>
    %120 = arith.truncf %111 : vector<2x32xf32> to vector<2x32xbf16>
    %cst_35 = arith.constant dense<0.000000e+00> : vector<2x128xf32>
    %121 = tpu.matmul %120, %9, %cst_35 {dimension_numbers = #tpu.dot_dimension_numbers<[1], [0], [0], [1], [0, 0, 1, 1], [], []>} : vector<2x32xbf16>, vector<32x128xbf16>, vector<2x128xf32> -> vector<2x128xf32>
    %122 = arith.addf %119, %121 : vector<2x128xf32>
    %123 = arith.negf %122 : vector<2x128xf32>
    %124 = math.exp %123 : vector<2x128xf32>
    %cst_36 = arith.constant 1.000000e+00 : f32
    %125 = vector.broadcast %cst_36 : f32 to vector<2x128xf32>
    %126 = arith.addf %125, %124 : vector<2x128xf32>
    %127 = arith.divf %125, %126 : vector<2x128xf32>
    %128 = math.tanh %122 : vector<2x128xf32>
    %129 = vector.extract_strided_slice %127 {offsets = [0, 0], sizes = [2, 32], strides = [1, 1]} : vector<2x128xf32> to vector<2x32xf32>
    %130 = vector.extract_strided_slice %127 {offsets = [0, 32], sizes = [2, 32], strides = [1, 1]} : vector<2x128xf32> to vector<2x32xf32>
    %131 = vector.extract_strided_slice %128 {offsets = [0, 64], sizes = [2, 32], strides = [1, 1]} : vector<2x128xf32> to vector<2x32xf32>
    %132 = vector.extract_strided_slice %127 {offsets = [0, 96], sizes = [2, 32], strides = [1, 1]} : vector<2x128xf32> to vector<2x32xf32>
    %133 = arith.mulf %130, %109 : vector<2x32xf32>
    %134 = arith.mulf %129, %131 : vector<2x32xf32>
    %135 = arith.addf %133, %134 : vector<2x32xf32>
    %136 = math.tanh %135 : vector<2x32xf32>
    %137 = arith.mulf %132, %136 : vector<2x32xf32>
    %cst_37 = arith.constant dense<0.000000e+00> : vector<2x128xf32>
    %138 = tpu.matmul %137, %10, %cst_37 {dimension_numbers = #tpu.dot_dimension_numbers<[1], [0], [0], [1], [0, 0, 1, 1], [], []>} : vector<2x32xf32>, vector<32x128xf32>, vector<2x128xf32> -> vector<2x128xf32>
    %139 = vector.broadcast %11 : vector<1x128xf32> to vector<2x128xf32>
    %140 = arith.addf %138, %139 : vector<2x128xf32>
    %c4 = arith.constant 4 : index
    %c0_38 = arith.constant 0 : index
    %c0_39 = arith.constant 0 : index
    %141 = vector.load %arg10[%c4, %c0_38, %c0_39] : memref<8x2x128xf32, #tpu.memory_space<vmem>>, vector<1x2x128xf32>
    %142 = vector.shape_cast %141 : vector<1x2x128xf32> to vector<2x128xf32>
    %143 = vector.shape_cast %140 : vector<2x128xf32> to vector<1x2x128xf32>
    tpu.vector_store %arg10[%c4, %c0_38, %c0_39], %143 {strides = array<i32>} : memref<8x2x128xf32, #tpu.memory_space<vmem>>, vector<1x2x128xf32>,
    %144 = vector.extract_strided_slice %7 {offsets = [0, 5, 0], sizes = [2, 1, 128], strides = [1, 1, 1]} : vector<2x8x128xf32> to vector<2x1x128xf32>
    %145 = vector.shape_cast %144 : vector<2x1x128xf32> to vector<2x128xf32>
    %146 = arith.truncf %137 : vector<2x32xf32> to vector<2x32xbf16>
    %cst_40 = arith.constant dense<0.000000e+00> : vector<2x128xf32>
    %147 = tpu.matmul %146, %9, %cst_40 {dimension_numbers = #tpu.dot_dimension_numbers<[1], [0], [0], [1], [0, 0, 1, 1], [], []>} : vector<2x32xbf16>, vector<32x128xbf16>, vector<2x128xf32> -> vector<2x128xf32>
    %148 = arith.addf %145, %147 : vector<2x128xf32>
    %149 = arith.negf %148 : vector<2x128xf32>
    %150 = math.exp %149 : vector<2x128xf32>
    %cst_41 = arith.constant 1.000000e+00 : f32
    %151 = vector.broadcast %cst_41 : f32 to vector<2x128xf32>
    %152 = arith.addf %151, %150 : vector<2x128xf32>
    %153 = arith.divf %151, %152 : vector<2x128xf32>
    %154 = math.tanh %148 : vector<2x128xf32>
    %155 = vector.extract_strided_slice %153 {offsets = [0, 0], sizes = [2, 32], strides = [1, 1]} : vector<2x128xf32> to vector<2x32xf32>
    %156 = vector.extract_strided_slice %153 {offsets = [0, 32], sizes = [2, 32], strides = [1, 1]} : vector<2x128xf32> to vector<2x32xf32>
    %157 = vector.extract_strided_slice %154 {offsets = [0, 64], sizes = [2, 32], strides = [1, 1]} : vector<2x128xf32> to vector<2x32xf32>
    %158 = vector.extract_strided_slice %153 {offsets = [0, 96], sizes = [2, 32], strides = [1, 1]} : vector<2x128xf32> to vector<2x32xf32>
    %159 = arith.mulf %156, %135 : vector<2x32xf32>
    %160 = arith.mulf %155, %157 : vector<2x32xf32>
    %161 = arith.addf %159, %160 : vector<2x32xf32>
    %162 = math.tanh %161 : vector<2x32xf32>
    %163 = arith.mulf %158, %162 : vector<2x32xf32>
    %cst_42 = arith.constant dense<0.000000e+00> : vector<2x128xf32>
    %164 = tpu.matmul %163, %10, %cst_42 {dimension_numbers = #tpu.dot_dimension_numbers<[1], [0], [0], [1], [0, 0, 1, 1], [], []>} : vector<2x32xf32>, vector<32x128xf32>, vector<2x128xf32> -> vector<2x128xf32>
    %165 = vector.broadcast %11 : vector<1x128xf32> to vector<2x128xf32>
    %166 = arith.addf %164, %165 : vector<2x128xf32>
    %c5 = arith.constant 5 : index
    %c0_43 = arith.constant 0 : index
    %c0_44 = arith.constant 0 : index
    %167 = vector.load %arg10[%c5, %c0_43, %c0_44] : memref<8x2x128xf32, #tpu.memory_space<vmem>>, vector<1x2x128xf32>
    %168 = vector.shape_cast %167 : vector<1x2x128xf32> to vector<2x128xf32>
    %169 = vector.shape_cast %166 : vector<2x128xf32> to vector<1x2x128xf32>
    tpu.vector_store %arg10[%c5, %c0_43, %c0_44], %169 {strides = array<i32>} : memref<8x2x128xf32, #tpu.memory_space<vmem>>, vector<1x2x128xf32>,
    %170 = vector.extract_strided_slice %7 {offsets = [0, 6, 0], sizes = [2, 1, 128], strides = [1, 1, 1]} : vector<2x8x128xf32> to vector<2x1x128xf32>
    %171 = vector.shape_cast %170 : vector<2x1x128xf32> to vector<2x128xf32>
    %172 = arith.truncf %163 : vector<2x32xf32> to vector<2x32xbf16>
    %cst_45 = arith.constant dense<0.000000e+00> : vector<2x128xf32>
    %173 = tpu.matmul %172, %9, %cst_45 {dimension_numbers = #tpu.dot_dimension_numbers<[1], [0], [0], [1], [0, 0, 1, 1], [], []>} : vector<2x32xbf16>, vector<32x128xbf16>, vector<2x128xf32> -> vector<2x128xf32>
    %174 = arith.addf %171, %173 : vector<2x128xf32>
    %175 = arith.negf %174 : vector<2x128xf32>
    %176 = math.exp %175 : vector<2x128xf32>
    %cst_46 = arith.constant 1.000000e+00 : f32
    %177 = vector.broadcast %cst_46 : f32 to vector<2x128xf32>
    %178 = arith.addf %177, %176 : vector<2x128xf32>
    %179 = arith.divf %177, %178 : vector<2x128xf32>
    %180 = math.tanh %174 : vector<2x128xf32>
    %181 = vector.extract_strided_slice %179 {offsets = [0, 0], sizes = [2, 32], strides = [1, 1]} : vector<2x128xf32> to vector<2x32xf32>
    %182 = vector.extract_strided_slice %179 {offsets = [0, 32], sizes = [2, 32], strides = [1, 1]} : vector<2x128xf32> to vector<2x32xf32>
    %183 = vector.extract_strided_slice %180 {offsets = [0, 64], sizes = [2, 32], strides = [1, 1]} : vector<2x128xf32> to vector<2x32xf32>
    %184 = vector.extract_strided_slice %179 {offsets = [0, 96], sizes = [2, 32], strides = [1, 1]} : vector<2x128xf32> to vector<2x32xf32>
    %185 = arith.mulf %182, %161 : vector<2x32xf32>
    %186 = arith.mulf %181, %183 : vector<2x32xf32>
    %187 = arith.addf %185, %186 : vector<2x32xf32>
    %188 = math.tanh %187 : vector<2x32xf32>
    %189 = arith.mulf %184, %188 : vector<2x32xf32>
    %cst_47 = arith.constant dense<0.000000e+00> : vector<2x128xf32>
    %190 = tpu.matmul %189, %10, %cst_47 {dimension_numbers = #tpu.dot_dimension_numbers<[1], [0], [0], [1], [0, 0, 1, 1], [], []>} : vector<2x32xf32>, vector<32x128xf32>, vector<2x128xf32> -> vector<2x128xf32>
    %191 = vector.broadcast %11 : vector<1x128xf32> to vector<2x128xf32>
    %192 = arith.addf %190, %191 : vector<2x128xf32>
    %c6 = arith.constant 6 : index
    %c0_48 = arith.constant 0 : index
    %c0_49 = arith.constant 0 : index
    %193 = vector.load %arg10[%c6, %c0_48, %c0_49] : memref<8x2x128xf32, #tpu.memory_space<vmem>>, vector<1x2x128xf32>
    %194 = vector.shape_cast %193 : vector<1x2x128xf32> to vector<2x128xf32>
    %195 = vector.shape_cast %192 : vector<2x128xf32> to vector<1x2x128xf32>
    tpu.vector_store %arg10[%c6, %c0_48, %c0_49], %195 {strides = array<i32>} : memref<8x2x128xf32, #tpu.memory_space<vmem>>, vector<1x2x128xf32>,
    %196 = vector.extract_strided_slice %7 {offsets = [0, 7, 0], sizes = [2, 1, 128], strides = [1, 1, 1]} : vector<2x8x128xf32> to vector<2x1x128xf32>
    %197 = vector.shape_cast %196 : vector<2x1x128xf32> to vector<2x128xf32>
    %198 = arith.truncf %189 : vector<2x32xf32> to vector<2x32xbf16>
    %cst_50 = arith.constant dense<0.000000e+00> : vector<2x128xf32>
    %199 = tpu.matmul %198, %9, %cst_50 {dimension_numbers = #tpu.dot_dimension_numbers<[1], [0], [0], [1], [0, 0, 1, 1], [], []>} : vector<2x32xbf16>, vector<32x128xbf16>, vector<2x128xf32> -> vector<2x128xf32>
    %200 = arith.addf %197, %199 : vector<2x128xf32>
    %201 = arith.negf %200 : vector<2x128xf32>
    %202 = math.exp %201 : vector<2x128xf32>
    %cst_51 = arith.constant 1.000000e+00 : f32
    %203 = vector.broadcast %cst_51 : f32 to vector<2x128xf32>
    %204 = arith.addf %203, %202 : vector<2x128xf32>
    %205 = arith.divf %203, %204 : vector<2x128xf32>
    %206 = math.tanh %200 : vector<2x128xf32>
    %207 = vector.extract_strided_slice %205 {offsets = [0, 0], sizes = [2, 32], strides = [1, 1]} : vector<2x128xf32> to vector<2x32xf32>
    %208 = vector.extract_strided_slice %205 {offsets = [0, 32], sizes = [2, 32], strides = [1, 1]} : vector<2x128xf32> to vector<2x32xf32>
    %209 = vector.extract_strided_slice %206 {offsets = [0, 64], sizes = [2, 32], strides = [1, 1]} : vector<2x128xf32> to vector<2x32xf32>
    %210 = vector.extract_strided_slice %205 {offsets = [0, 96], sizes = [2, 32], strides = [1, 1]} : vector<2x128xf32> to vector<2x32xf32>
    %211 = arith.mulf %208, %187 : vector<2x32xf32>
    %212 = arith.mulf %207, %209 : vector<2x32xf32>
    %213 = arith.addf %211, %212 : vector<2x32xf32>
    %214 = math.tanh %213 : vector<2x32xf32>
    %215 = arith.mulf %210, %214 : vector<2x32xf32>
    %cst_52 = arith.constant dense<0.000000e+00> : vector<2x128xf32>
    %216 = tpu.matmul %215, %10, %cst_52 {dimension_numbers = #tpu.dot_dimension_numbers<[1], [0], [0], [1], [0, 0, 1, 1], [], []>} : vector<2x32xf32>, vector<32x128xf32>, vector<2x128xf32> -> vector<2x128xf32>
    %217 = vector.broadcast %11 : vector<1x128xf32> to vector<2x128xf32>
    %218 = arith.addf %216, %217 : vector<2x128xf32>
    %c7 = arith.constant 7 : index
    %c0_53 = arith.constant 0 : index
    %c0_54 = arith.constant 0 : index
    %219 = vector.load %arg10[%c7, %c0_53, %c0_54] : memref<8x2x128xf32, #tpu.memory_space<vmem>>, vector<1x2x128xf32>
    %220 = vector.shape_cast %219 : vector<1x2x128xf32> to vector<2x128xf32>
    %221 = vector.shape_cast %218 : vector<2x128xf32> to vector<1x2x128xf32>
    tpu.vector_store %arg10[%c7, %c0_53, %c0_54], %221 {strides = array<i32>} : memref<8x2x128xf32, #tpu.memory_space<vmem>>, vector<1x2x128xf32>,
    %c0_55 = arith.constant 0 : index
    %c0_56 = arith.constant 0 : index
    %222 = vector.load %arg5[%c0_55, %c0_56] : memref<32x128xf32, #tpu.memory_space<vmem>>, vector<32x128xf32>
    %223 = arith.truncf %222 : vector<32x128xf32> to vector<32x128xbf16>
    %cst_57 = arith.constant 0.000000e+00 : f32
    %224 = vector.broadcast %cst_57 : f32 to vector<2x32xf32>
    %cst_58 = arith.constant 0.000000e+00 : f32
    %225 = vector.broadcast %cst_58 : f32 to vector<2x32xf32>
    %c0_59 = arith.constant 0 : index
    %c0_60 = arith.constant 0 : index
    %c0_61 = arith.constant 0 : index
    %226 = vector.load %arg10[%c0_59, %c0_60, %c0_61] : memref<8x2x128xf32, #tpu.memory_space<vmem>>, vector<1x2x128xf32>
    %227 = vector.shape_cast %226 : vector<1x2x128xf32> to vector<2x128xf32>
    %228 = arith.truncf %224 : vector<2x32xf32> to vector<2x32xbf16>
    %cst_62 = arith.constant dense<0.000000e+00> : vector<2x128xf32>
    %229 = tpu.matmul %228, %223, %cst_62 {dimension_numbers = #tpu.dot_dimension_numbers<[1], [0], [0], [1], [0, 0, 1, 1], [], []>} : vector<2x32xbf16>, vector<32x128xbf16>, vector<2x128xf32> -> vector<2x128xf32>
    %230 = arith.addf %227, %229 : vector<2x128xf32>
    %231 = arith.negf %230 : vector<2x128xf32>
    %232 = math.exp %231 : vector<2x128xf32>
    %cst_63 = arith.constant 1.000000e+00 : f32
    %233 = vector.broadcast %cst_63 : f32 to vector<2x128xf32>
    %234 = arith.addf %233, %232 : vector<2x128xf32>
    %235 = arith.divf %233, %234 : vector<2x128xf32>
    %236 = math.tanh %230 : vector<2x128xf32>
    %237 = vector.extract_strided_slice %235 {offsets = [0, 0], sizes = [2, 32], strides = [1, 1]} : vector<2x128xf32> to vector<2x32xf32>
    %238 = vector.extract_strided_slice %235 {offsets = [0, 32], sizes = [2, 32], strides = [1, 1]} : vector<2x128xf32> to vector<2x32xf32>
    %239 = vector.extract_strided_slice %236 {offsets = [0, 64], sizes = [2, 32], strides = [1, 1]} : vector<2x128xf32> to vector<2x32xf32>
    %240 = vector.extract_strided_slice %235 {offsets = [0, 96], sizes = [2, 32], strides = [1, 1]} : vector<2x128xf32> to vector<2x32xf32>
    %241 = arith.mulf %238, %225 : vector<2x32xf32>
    %242 = arith.mulf %237, %239 : vector<2x32xf32>
    %243 = arith.addf %241, %242 : vector<2x32xf32>
    %244 = math.tanh %243 : vector<2x32xf32>
    %245 = arith.mulf %240, %244 : vector<2x32xf32>
    %c1_64 = arith.constant 1 : index
    %c0_65 = arith.constant 0 : index
    %c0_66 = arith.constant 0 : index
    %246 = vector.load %arg10[%c1_64, %c0_65, %c0_66] : memref<8x2x128xf32, #tpu.memory_space<vmem>>, vector<1x2x128xf32>
    %247 = vector.shape_cast %246 : vector<1x2x128xf32> to vector<2x128xf32>
    %248 = arith.truncf %245 : vector<2x32xf32> to vector<2x32xbf16>
    %cst_67 = arith.constant dense<0.000000e+00> : vector<2x128xf32>
    %249 = tpu.matmul %248, %223, %cst_67 {dimension_numbers = #tpu.dot_dimension_numbers<[1], [0], [0], [1], [0, 0, 1, 1], [], []>} : vector<2x32xbf16>, vector<32x128xbf16>, vector<2x128xf32> -> vector<2x128xf32>
    %250 = arith.addf %247, %249 : vector<2x128xf32>
    %251 = arith.negf %250 : vector<2x128xf32>
    %252 = math.exp %251 : vector<2x128xf32>
    %cst_68 = arith.constant 1.000000e+00 : f32
    %253 = vector.broadcast %cst_68 : f32 to vector<2x128xf32>
    %254 = arith.addf %253, %252 : vector<2x128xf32>
    %255 = arith.divf %253, %254 : vector<2x128xf32>
    %256 = math.tanh %250 : vector<2x128xf32>
    %257 = vector.extract_strided_slice %255 {offsets = [0, 0], sizes = [2, 32], strides = [1, 1]} : vector<2x128xf32> to vector<2x32xf32>
    %258 = vector.extract_strided_slice %255 {offsets = [0, 32], sizes = [2, 32], strides = [1, 1]} : vector<2x128xf32> to vector<2x32xf32>
    %259 = vector.extract_strided_slice %256 {offsets = [0, 64], sizes = [2, 32], strides = [1, 1]} : vector<2x128xf32> to vector<2x32xf32>
    %260 = vector.extract_strided_slice %255 {offsets = [0, 96], sizes = [2, 32], strides = [1, 1]} : vector<2x128xf32> to vector<2x32xf32>
    %261 = arith.mulf %258, %243 : vector<2x32xf32>
    %262 = arith.mulf %257, %259 : vector<2x32xf32>
    %263 = arith.addf %261, %262 : vector<2x32xf32>
    %264 = math.tanh %263 : vector<2x32xf32>
    %265 = arith.mulf %260, %264 : vector<2x32xf32>
    %c2_69 = arith.constant 2 : index
    %c0_70 = arith.constant 0 : index
    %c0_71 = arith.constant 0 : index
    %266 = vector.load %arg10[%c2_69, %c0_70, %c0_71] : memref<8x2x128xf32, #tpu.memory_space<vmem>>, vector<1x2x128xf32>
    %267 = vector.shape_cast %266 : vector<1x2x128xf32> to vector<2x128xf32>
    %268 = arith.truncf %265 : vector<2x32xf32> to vector<2x32xbf16>
    %cst_72 = arith.constant dense<0.000000e+00> : vector<2x128xf32>
    %269 = tpu.matmul %268, %223, %cst_72 {dimension_numbers = #tpu.dot_dimension_numbers<[1], [0], [0], [1], [0, 0, 1, 1], [], []>} : vector<2x32xbf16>, vector<32x128xbf16>, vector<2x128xf32> -> vector<2x128xf32>
    %270 = arith.addf %267, %269 : vector<2x128xf32>
    %271 = arith.negf %270 : vector<2x128xf32>
    %272 = math.exp %271 : vector<2x128xf32>
    %cst_73 = arith.constant 1.000000e+00 : f32
    %273 = vector.broadcast %cst_73 : f32 to vector<2x128xf32>
    %274 = arith.addf %273, %272 : vector<2x128xf32>
    %275 = arith.divf %273, %274 : vector<2x128xf32>
    %276 = math.tanh %270 : vector<2x128xf32>
    %277 = vector.extract_strided_slice %275 {offsets = [0, 0], sizes = [2, 32], strides = [1, 1]} : vector<2x128xf32> to vector<2x32xf32>
    %278 = vector.extract_strided_slice %275 {offsets = [0, 32], sizes = [2, 32], strides = [1, 1]} : vector<2x128xf32> to vector<2x32xf32>
    %279 = vector.extract_strided_slice %276 {offsets = [0, 64], sizes = [2, 32], strides = [1, 1]} : vector<2x128xf32> to vector<2x32xf32>
    %280 = vector.extract_strided_slice %275 {offsets = [0, 96], sizes = [2, 32], strides = [1, 1]} : vector<2x128xf32> to vector<2x32xf32>
    %281 = arith.mulf %278, %263 : vector<2x32xf32>
    %282 = arith.mulf %277, %279 : vector<2x32xf32>
    %283 = arith.addf %281, %282 : vector<2x32xf32>
    %284 = math.tanh %283 : vector<2x32xf32>
    %285 = arith.mulf %280, %284 : vector<2x32xf32>
    %c3_74 = arith.constant 3 : index
    %c0_75 = arith.constant 0 : index
    %c0_76 = arith.constant 0 : index
    %286 = vector.load %arg10[%c3_74, %c0_75, %c0_76] : memref<8x2x128xf32, #tpu.memory_space<vmem>>, vector<1x2x128xf32>
    %287 = vector.shape_cast %286 : vector<1x2x128xf32> to vector<2x128xf32>
    %288 = arith.truncf %285 : vector<2x32xf32> to vector<2x32xbf16>
    %cst_77 = arith.constant dense<0.000000e+00> : vector<2x128xf32>
    %289 = tpu.matmul %288, %223, %cst_77 {dimension_numbers = #tpu.dot_dimension_numbers<[1], [0], [0], [1], [0, 0, 1, 1], [], []>} : vector<2x32xbf16>, vector<32x128xbf16>, vector<2x128xf32> -> vector<2x128xf32>
    %290 = arith.addf %287, %289 : vector<2x128xf32>
    %291 = arith.negf %290 : vector<2x128xf32>
    %292 = math.exp %291 : vector<2x128xf32>
    %cst_78 = arith.constant 1.000000e+00 : f32
    %293 = vector.broadcast %cst_78 : f32 to vector<2x128xf32>
    %294 = arith.addf %293, %292 : vector<2x128xf32>
    %295 = arith.divf %293, %294 : vector<2x128xf32>
    %296 = math.tanh %290 : vector<2x128xf32>
    %297 = vector.extract_strided_slice %295 {offsets = [0, 0], sizes = [2, 32], strides = [1, 1]} : vector<2x128xf32> to vector<2x32xf32>
    %298 = vector.extract_strided_slice %295 {offsets = [0, 32], sizes = [2, 32], strides = [1, 1]} : vector<2x128xf32> to vector<2x32xf32>
    %299 = vector.extract_strided_slice %296 {offsets = [0, 64], sizes = [2, 32], strides = [1, 1]} : vector<2x128xf32> to vector<2x32xf32>
    %300 = vector.extract_strided_slice %295 {offsets = [0, 96], sizes = [2, 32], strides = [1, 1]} : vector<2x128xf32> to vector<2x32xf32>
    %301 = arith.mulf %298, %283 : vector<2x32xf32>
    %302 = arith.mulf %297, %299 : vector<2x32xf32>
    %303 = arith.addf %301, %302 : vector<2x32xf32>
    %304 = math.tanh %303 : vector<2x32xf32>
    %305 = arith.mulf %300, %304 : vector<2x32xf32>
    %c4_79 = arith.constant 4 : index
    %c0_80 = arith.constant 0 : index
    %c0_81 = arith.constant 0 : index
    %306 = vector.load %arg10[%c4_79, %c0_80, %c0_81] : memref<8x2x128xf32, #tpu.memory_space<vmem>>, vector<1x2x128xf32>
    %307 = vector.shape_cast %306 : vector<1x2x128xf32> to vector<2x128xf32>
    %308 = arith.truncf %305 : vector<2x32xf32> to vector<2x32xbf16>
    %cst_82 = arith.constant dense<0.000000e+00> : vector<2x128xf32>
    %309 = tpu.matmul %308, %223, %cst_82 {dimension_numbers = #tpu.dot_dimension_numbers<[1], [0], [0], [1], [0, 0, 1, 1], [], []>} : vector<2x32xbf16>, vector<32x128xbf16>, vector<2x128xf32> -> vector<2x128xf32>
    %310 = arith.addf %307, %309 : vector<2x128xf32>
    %311 = arith.negf %310 : vector<2x128xf32>
    %312 = math.exp %311 : vector<2x128xf32>
    %cst_83 = arith.constant 1.000000e+00 : f32
    %313 = vector.broadcast %cst_83 : f32 to vector<2x128xf32>
    %314 = arith.addf %313, %312 : vector<2x128xf32>
    %315 = arith.divf %313, %314 : vector<2x128xf32>
    %316 = math.tanh %310 : vector<2x128xf32>
    %317 = vector.extract_strided_slice %315 {offsets = [0, 0], sizes = [2, 32], strides = [1, 1]} : vector<2x128xf32> to vector<2x32xf32>
    %318 = vector.extract_strided_slice %315 {offsets = [0, 32], sizes = [2, 32], strides = [1, 1]} : vector<2x128xf32> to vector<2x32xf32>
    %319 = vector.extract_strided_slice %316 {offsets = [0, 64], sizes = [2, 32], strides = [1, 1]} : vector<2x128xf32> to vector<2x32xf32>
    %320 = vector.extract_strided_slice %315 {offsets = [0, 96], sizes = [2, 32], strides = [1, 1]} : vector<2x128xf32> to vector<2x32xf32>
    %321 = arith.mulf %318, %303 : vector<2x32xf32>
    %322 = arith.mulf %317, %319 : vector<2x32xf32>
    %323 = arith.addf %321, %322 : vector<2x32xf32>
    %324 = math.tanh %323 : vector<2x32xf32>
    %325 = arith.mulf %320, %324 : vector<2x32xf32>
    %c5_84 = arith.constant 5 : index
    %c0_85 = arith.constant 0 : index
    %c0_86 = arith.constant 0 : index
    %326 = vector.load %arg10[%c5_84, %c0_85, %c0_86] : memref<8x2x128xf32, #tpu.memory_space<vmem>>, vector<1x2x128xf32>
    %327 = vector.shape_cast %326 : vector<1x2x128xf32> to vector<2x128xf32>
    %328 = arith.truncf %325 : vector<2x32xf32> to vector<2x32xbf16>
    %cst_87 = arith.constant dense<0.000000e+00> : vector<2x128xf32>
    %329 = tpu.matmul %328, %223, %cst_87 {dimension_numbers = #tpu.dot_dimension_numbers<[1], [0], [0], [1], [0, 0, 1, 1], [], []>} : vector<2x32xbf16>, vector<32x128xbf16>, vector<2x128xf32> -> vector<2x128xf32>
    %330 = arith.addf %327, %329 : vector<2x128xf32>
    %331 = arith.negf %330 : vector<2x128xf32>
    %332 = math.exp %331 : vector<2x128xf32>
    %cst_88 = arith.constant 1.000000e+00 : f32
    %333 = vector.broadcast %cst_88 : f32 to vector<2x128xf32>
    %334 = arith.addf %333, %332 : vector<2x128xf32>
    %335 = arith.divf %333, %334 : vector<2x128xf32>
    %336 = math.tanh %330 : vector<2x128xf32>
    %337 = vector.extract_strided_slice %335 {offsets = [0, 0], sizes = [2, 32], strides = [1, 1]} : vector<2x128xf32> to vector<2x32xf32>
    %338 = vector.extract_strided_slice %335 {offsets = [0, 32], sizes = [2, 32], strides = [1, 1]} : vector<2x128xf32> to vector<2x32xf32>
    %339 = vector.extract_strided_slice %336 {offsets = [0, 64], sizes = [2, 32], strides = [1, 1]} : vector<2x128xf32> to vector<2x32xf32>
    %340 = vector.extract_strided_slice %335 {offsets = [0, 96], sizes = [2, 32], strides = [1, 1]} : vector<2x128xf32> to vector<2x32xf32>
    %341 = arith.mulf %338, %323 : vector<2x32xf32>
    %342 = arith.mulf %337, %339 : vector<2x32xf32>
    %343 = arith.addf %341, %342 : vector<2x32xf32>
    %344 = math.tanh %343 : vector<2x32xf32>
    %345 = arith.mulf %340, %344 : vector<2x32xf32>
    %c6_89 = arith.constant 6 : index
    %c0_90 = arith.constant 0 : index
    %c0_91 = arith.constant 0 : index
    %346 = vector.load %arg10[%c6_89, %c0_90, %c0_91] : memref<8x2x128xf32, #tpu.memory_space<vmem>>, vector<1x2x128xf32>
    %347 = vector.shape_cast %346 : vector<1x2x128xf32> to vector<2x128xf32>
    %348 = arith.truncf %345 : vector<2x32xf32> to vector<2x32xbf16>
    %cst_92 = arith.constant dense<0.000000e+00> : vector<2x128xf32>
    %349 = tpu.matmul %348, %223, %cst_92 {dimension_numbers = #tpu.dot_dimension_numbers<[1], [0], [0], [1], [0, 0, 1, 1], [], []>} : vector<2x32xbf16>, vector<32x128xbf16>, vector<2x128xf32> -> vector<2x128xf32>
    %350 = arith.addf %347, %349 : vector<2x128xf32>
    %351 = arith.negf %350 : vector<2x128xf32>
    %352 = math.exp %351 : vector<2x128xf32>
    %cst_93 = arith.constant 1.000000e+00 : f32
    %353 = vector.broadcast %cst_93 : f32 to vector<2x128xf32>
    %354 = arith.addf %353, %352 : vector<2x128xf32>
    %355 = arith.divf %353, %354 : vector<2x128xf32>
    %356 = math.tanh %350 : vector<2x128xf32>
    %357 = vector.extract_strided_slice %355 {offsets = [0, 0], sizes = [2, 32], strides = [1, 1]} : vector<2x128xf32> to vector<2x32xf32>
    %358 = vector.extract_strided_slice %355 {offsets = [0, 32], sizes = [2, 32], strides = [1, 1]} : vector<2x128xf32> to vector<2x32xf32>
    %359 = vector.extract_strided_slice %356 {offsets = [0, 64], sizes = [2, 32], strides = [1, 1]} : vector<2x128xf32> to vector<2x32xf32>
    %360 = vector.extract_strided_slice %355 {offsets = [0, 96], sizes = [2, 32], strides = [1, 1]} : vector<2x128xf32> to vector<2x32xf32>
    %361 = arith.mulf %358, %343 : vector<2x32xf32>
    %362 = arith.mulf %357, %359 : vector<2x32xf32>
    %363 = arith.addf %361, %362 : vector<2x32xf32>
    %364 = math.tanh %363 : vector<2x32xf32>
    %365 = arith.mulf %360, %364 : vector<2x32xf32>
    %c7_94 = arith.constant 7 : index
    %c0_95 = arith.constant 0 : index
    %c0_96 = arith.constant 0 : index
    %366 = vector.load %arg10[%c7_94, %c0_95, %c0_96] : memref<8x2x128xf32, #tpu.memory_space<vmem>>, vector<1x2x128xf32>
    %367 = vector.shape_cast %366 : vector<1x2x128xf32> to vector<2x128xf32>
    %368 = arith.truncf %365 : vector<2x32xf32> to vector<2x32xbf16>
    %cst_97 = arith.constant dense<0.000000e+00> : vector<2x128xf32>
    %369 = tpu.matmul %368, %223, %cst_97 {dimension_numbers = #tpu.dot_dimension_numbers<[1], [0], [0], [1], [0, 0, 1, 1], [], []>} : vector<2x32xbf16>, vector<32x128xbf16>, vector<2x128xf32> -> vector<2x128xf32>
    %370 = arith.addf %367, %369 : vector<2x128xf32>
    %371 = arith.negf %370 : vector<2x128xf32>
    %372 = math.exp %371 : vector<2x128xf32>
    %cst_98 = arith.constant 1.000000e+00 : f32
    %373 = vector.broadcast %cst_98 : f32 to vector<2x128xf32>
    %374 = arith.addf %373, %372 : vector<2x128xf32>
    %375 = arith.divf %373, %374 : vector<2x128xf32>
    %376 = math.tanh %370 : vector<2x128xf32>
    %377 = vector.extract_strided_slice %375 {offsets = [0, 0], sizes = [2, 32], strides = [1, 1]} : vector<2x128xf32> to vector<2x32xf32>
    %378 = vector.extract_strided_slice %375 {offsets = [0, 32], sizes = [2, 32], strides = [1, 1]} : vector<2x128xf32> to vector<2x32xf32>
    %379 = vector.extract_strided_slice %376 {offsets = [0, 64], sizes = [2, 32], strides = [1, 1]} : vector<2x128xf32> to vector<2x32xf32>
    %380 = vector.extract_strided_slice %375 {offsets = [0, 96], sizes = [2, 32], strides = [1, 1]} : vector<2x128xf32> to vector<2x32xf32>
    %381 = arith.mulf %378, %363 : vector<2x32xf32>
    %382 = arith.mulf %377, %379 : vector<2x32xf32>
    %383 = arith.addf %381, %382 : vector<2x32xf32>
    %384 = math.tanh %383 : vector<2x32xf32>
    %385 = arith.mulf %380, %384 : vector<2x32xf32>
    %c0_99 = arith.constant 0 : index
    %c0_100 = arith.constant 0 : index
    %386 = vector.load %arg7[%c0_99, %c0_100] : memref<1x32xf32, #tpu.memory_space<vmem>>, vector<1x32xf32>
    %c0_101 = arith.constant 0 : index
    %c0_102 = arith.constant 0 : index
    %387 = vector.load %arg8[%c0_101, %c0_102] : memref<1x1xf32, #tpu.memory_space<vmem>>, vector<1x1xf32>
    %388 = vector.broadcast %386 : vector<1x32xf32> to vector<2x32xf32>
    %389 = arith.mulf %385, %388 : vector<2x32xf32>
    %cst_103 = arith.constant dense<0.000000e+00> : vector<2xf32>
    %390 = vector.multi_reduction <add>, %389, %cst_103 [1] : vector<2x32xf32> to vector<2xf32>
    %391 = vector.shape_cast %390 : vector<2xf32> to vector<2x1xf32>
    %392 = vector.broadcast %387 : vector<1x1xf32> to vector<2x1xf32>
    %393 = arith.addf %391, %392 : vector<2x1xf32>
    %c0_104 = arith.constant 0 : index
    %c0_105 = arith.constant 0 : index
    %394 = vector.load %arg9[%c0_104, %c0_105] : memref<2x1xf32, #tpu.memory_space<vmem>>, vector<2x1xf32>
    tpu.vector_store %arg9[%c0_104, %c0_105], %393 {strides = array<i32>} : memref<2x1xf32, #tpu.memory_space<vmem>>, vector<2x1xf32>,
    return
  }
}

</mosaic_0001>

<bundles_post_ra>
// kernel: tpu_custom_call.1
= control target key start
LH: loop header
LB: loop body
LE: loop exit
PB: predicated region body
PF: predicated region fallthrough
CT: control target
= control target key end

     0   :  { %s2535_s0 = inlined_call_operand.vmem [shape: f32[2,8,4], index: 0, kind: input, shape index: {}]   ;;  %s2536_s1 = inlined_call_operand.vmem [shape: f32[4,128], index: 1, kind: input, shape index: {}]   ;;  %s2537_s2 = inlined_call_operand.hbm [shape: f32[32,128], index: 2, kind: input, shape index: {}]   ;;  %s2538_s3 = inlined_call_operand.vmem [shape: f32[1,128], index: 3, kind: input, shape index: {}]   ;;  %s2539_s4 = inlined_call_operand.hbm [shape: f32[32,128], index: 4, kind: input, shape index: {}]   ;;  %s2540_s5 = inlined_call_operand.hbm [shape: f32[32,128], index: 5, kind: input, shape index: {}]   ;;  %s2541_s6 = inlined_call_operand.vmem [shape: f32[1,128], index: 6, kind: input, shape index: {}]   ;;  %s2542_s7 = inlined_call_operand.vmem [shape: f32[1,32], index: 7, kind: input, shape index: {}]   ;;  %s2543_s8 = inlined_call_operand.<no memory space> [shape: f32[1,1], index: 8, kind: input, shape index: {}]   ;;  %s2544_s9 = inlined_call_operand.vmem [shape: f32[2,1], index: 9, kind: output, shape index: {}]  }
   0x1   :  { %v14_v0 = vstv %s2543_s8 }
   0x2   :  { %15 = vst [vmem:[#allocation3] sm:$0x1] %v14_v0 }
   0x3   :  { %16 = vsyncpa [#allocation5], 0 }
   0x4   :  { %17 = vsyncpa [#allocation7], 0  ;;  %s41_s13 = sshll.u32 %s2539_s4, 4  ;;  %s2112_s14 = smov [#allocation6]   ;;  %s42_s13 = int_to_ptr.hbm [resolvable:$true] %s41_s13 }
   0x5   :  { %s43_s15 = sshll.u32 %s2112_s14, 4  ;;  %s26_s18 = sshll.u32 %s2537_s2, 4  ;;  %s44_s15 = int_to_ptr.vmem [resolvable:$true] %s43_s15  ;;  %s27_s18 = int_to_ptr.hbm [resolvable:$true] %s26_s18 }
   0x6   :  { %s2113_s19 = smov 128   ;;  %s2114_s20 = smov 8  }
   0x7   :  { %49 = dma.hbm_to_vmem [thread:$0]  %s42_s13, 512, %s44_s15, [#allocation7], %s2113_s19, %s2113_s19, %s2114_s20  }
   0x8   :  { %s2115_s8 = smov [#allocation4]   ;;  %s54_s24 = sshll.u32 %s2540_s5, 4  ;;  %s55_s24 = int_to_ptr.hbm [resolvable:$true] %s54_s24 }
   0x9   :  { %s28_s21 = sshll.u32 %s2115_s8, 4  ;;  %s2116_s4 = smov [#allocation8]   ;;  %s29_s21 = int_to_ptr.vmem [resolvable:$true] %s28_s21 }
   0xa   :  { %34 = dma.hbm_to_vmem [thread:$0]  %s27_s18, 512, %s29_s21, [#allocation5], %s2113_s19, %s2113_s19, %s2114_s20  }
   0xb   :  { %s56_s25 = sshll.u32 %s2116_s4, 4  ;;  %s57_s25 = int_to_ptr.vmem [resolvable:$true] %s56_s25 }
   0xc   :  { %62 = dma.hbm_to_vmem [thread:$0]  %s55_s24, 512, %s57_s25, [#allocation7], %s2113_s19, %s2113_s19, %s2114_s20  }
   0xd   :  { %2108 = dma.done.wait [#allocation5], 512  }
   0xe   :  { %2109 = vsyncadd [#allocation5], 4294966784 }
   0xf   :  { %2110 = dma.done.wait [#allocation7], 1024  }
  0x10   :  { %2111 = vsyncadd [#allocation7], 4294966272  ;;  %vm96_vm0 = vcmask 1043456   ;;  %vm89_vm1 = vcmask 31744   ;;  %v84_v1 = vld [vmem:[%s2536_s1] sm:$0xf] }
  0x11   :  { %v82_v2 = vld [vmem:[%s2535_s0] sm:$0xff]  ;;  %1781 = vmatpush.msk.msra.mxu0 %vm96_vm0, %v84_v1  ;;  %v126_v4 = vld [vmem:[#allocation4 + $0x18] sm:$0xff]  ;;  %v123_v5 = vld [vmem:[#allocation4] sm:$0xff]  ;;  %v2117_v10 = vmov 0   ;;  %vm237_vm10 = vcmask 1041409   ;;  %vm134_vm11 = vcmask 261120  }
  0x12   :  { %v125_v3 = vld [vmem:[#allocation4 + $0x10] sm:$0xff]  ;;  %v124_v6 = vld [vmem:[#allocation4 + $0x8] sm:$0xff]  ;;  %1782 = vmatmul.msk.f32.vlgmr.msra.gmra.mxu0 %vm89_vm1, %v82_v2  ;;  %s2120_s15 = smov 96  }
  0x13   :  { %v2190_v7 = vpack.c.bf16 %v126_v4, %v125_v3  ;;  %v2193_v8 = vpack.c.bf16 %v124_v6, %v123_v5  ;;  %v83_v9 = vld [vmem:[%s2535_s0 + $0x8] sm:$0xff]  ;;  %v1839_v12 = vld [vmem:[%s2538_s3] ss:$0 sm:$0xff]  ;;  %s2118_s0 = smov 64   ;;  %s2119_s3 = smov 32  }
  0x15   :  { %144 = vmatpush.bf16.msra.mxu1 %v2190_v7  ;;  %284 = vmatpush.bf16.msra.mxu3 %v2190_v7 }
  0x16   :  { %427 = vmatpush.bf16.msrb.mxu0 %v2190_v7 }
  0x19   :  { %145 = vmatpush.bf16.msra.mxu1 %v2193_v8  ;;  %285 = vmatpush.bf16.msra.mxu3 %v2193_v8 }
  0x1a   :  { %428 = vmatpush.bf16.msrb.mxu0 %v2193_v8 }
  0x1b   :  { %1783 = vmatmul.msk.f32.gmra.mxu0 %vm89_vm1, %v83_v9 }
  0x1c   :  { %146 = vmatmul.bf16.vlgmr.msra.gmra.mxu1 %v2117_v10 }
  0x1e   :  { %865 = vmatpush.bf16.msra.mxu0 %v2190_v7 }
  0x22   :  { %866 = vmatpush.bf16.msra.mxu0 %v2193_v8 }
  0x8f   :  { %v117_v11 = vpop.f32.mrf.mxu0 }
  0x90   :  { %v2213_v18 = vadd.f32 %v1839_v12, %v117_v11 }
  0x98   :  { %v120_v13 = vpop.f32.mrf.mxu0 }
  0x99   :  { %v2210_v14 = vadd.f32 %v1839_v12, %v120_v13  ;;  %v147_v15 = vpop.f32.mrf.mxu1 }
  0x9a   :  { %v152_v16 = vrot.slane %v147_v15, 1  ;;  %v155_v20 = vadd.f32 %v147_v15, %v2213_v18 }
  0x9c   :  { %v156_v17 = vadd.f32 %v152_v16, %v2210_v14  ;;  %v1784_v24 = vmul.f32 -1.442695, %v155_v20 }
  0x9e   :  { %1843 = vtanh.f32 %v156_v17  ;;  %v1785_v23 = vmul.f32 -1.442695, %v156_v17 }
  0x9f   :  { %1845 = vtanh.f32 %v155_v20 }
  0xa0   :  { %1847 = vpow2.f32 %v1785_v23 }
  0xa1   :  { %v149_v19 = vpop.f32.mrf.mxu1  ;;  %1849 = vpow2.f32 %v1784_v24 }
  0xa4   :  { %v1844_v21 = vpop.eup %1843 }
  0xa5   :  { %203 = vrot.lane.b32.xlu0 %v1844_v21, %s2118_s0  ;;  %v1846_v22 = vpop.eup %1845 }
  0xa6   :  { %v1848_v25 = vpop.eup %1847 }
  0xa7   :  { %v164_v26 = vadd.f32 1.0, %v1848_v25  ;;  %v1850_v27 = vpop.eup %1849 }
  0xa8   :  { %v163_v28 = vadd.f32 1.0, %v1850_v27 }
  0xa9   :  { %1851 = vrcp.f32 %v164_v26  ;;  %v191_v37 = vand.u32 2147483648, %v164_v26  ;;  %vm185_vm3 = vweird.f32 %v164_v26  ;;  %v189_v38 = vand.u32 2147483647, %v164_v26 }
  0xaa   :  { %1853 = vrcp.f32 %v163_v28  ;;  %v176_v46 = vand.u32 2147483648, %v163_v28  ;;  %vm170_vm7 = vweird.f32 %v163_v28  ;;  %v174_v47 = vand.u32 2147483647, %v163_v28 }
  0xab   :  { %v192_v41 = vor.u32 1.1754944e-38, %v191_v37  ;;  %vm190_vm5 = vcmp.eq.f32.partialorder %v189_v38, 8.507059e+37 }
  0xac   :  { %v177_v49 = vor.u32 1.1754944e-38, %v176_v46  ;;  %vm175_vm9 = vcmp.eq.f32.partialorder %v174_v47, 8.507059e+37 }
  0xad   :  { %201 = vrot.lane.b32.xlu0 %v1846_v22, %s2118_s0 }
  0xaf   :  { %v1852_v29 = vpop.eup %1851 }
  0xb0   :  { %v181_v30 = vmul.f32 %v1852_v29, %v164_v26  ;;  %v1854_v32 = vpop.eup %1853  ;;  %vm186_vm2 = vweird.f32 %v1852_v29 }
  0xb1   :  { %v166_v34 = vmul.f32 %v1854_v32, %v163_v28  ;;  %vm187_vm4 = vmor %vm185_vm3, %vm186_vm2  ;;  %vm171_vm6 = vweird.f32 %v1854_v32 }
  0xb2   :  { %v182_v31 = vsub.f32 1.0, %v181_v30  ;;  %vm172_vm8 = vmor %vm170_vm7, %vm171_vm6 }
  0xb3   :  { %v167_v36 = vsub.f32 1.0, %v166_v34 }
  0xb4   :  { %v183_v33 = vmul.f32 %v1852_v29, %v182_v31 }
  0xb5   :  { %v168_v40 = vmul.f32 %v1854_v32, %v167_v36 }
  0xb6   :  { %v184_v35 = vadd.f32 %v1852_v29, %v183_v33 }
  0xb7   :  { %v169_v45 = vadd.f32 %v1854_v32, %v168_v40 }
  0xb8   :  { %v188_v39 = vsel %vm187_vm4, %v1852_v29, %v184_v35 }
  0xb9   :  { %v193_v43 = vsel %vm190_vm5, %v192_v41, %v188_v39  ;;  %v173_v48 = vsel %vm172_vm8, %v1854_v32, %v169_v45 }
  0xba   :  { %v178_v51 = vsel %vm175_vm9, %v177_v49, %v173_v48  ;;  %v198_v53 = vmul.f32 0.0, %v193_v43 }
  0xbb   :  { %v197_v56 = vmul.f32 0.0, %v178_v51 }
 0x117   :  { %v204_v42 = vpop.permute.xlu0 %203 }
 0x118   :  { %v208_v44 = vmul.f32 %v204_v42, %v193_v43 }
 0x11a   :  { %213 = vrot.lane.b32.xlu1 %v208_v44, %s2119_s3 }
 0x11f   :  { %v202_v50 = vpop.permute.xlu0 %201 }
 0x120   :  { %v207_v52 = vmul.f32 %v202_v50, %v178_v51 }
 0x122   :  { %211 = vrot.lane.b32.xlu1 %v207_v52, %s2119_s3 }
 0x18c   :  { %v214_v54 = vpop.permute.xlu1 %213 }
 0x18d   :  { %v2220_v55 = vadd.f32 %v214_v54, %v198_v53 }
 0x18f   :  { %1855 = vtanh.f32 %v2220_v55  ;;  %v340_v53 = vrot.slane %v2220_v55, 7 }
 0x194   :  { %v212_v57 = vpop.permute.xlu1 %211 }
 0x195   :  { %v1856_v58 = vpop.eup %1855  ;;  %v2223_v59 = vadd.f32 %v212_v57, %v197_v56 }
 0x196   :  { %225 = vrot.lane.b32.xlu2 %v1856_v58, %s2118_s0 }
 0x197   :  { %1857 = vtanh.f32 %v2223_v59 }
 0x19d   :  { %v1858_v60 = vpop.eup %1857 }
 0x19e   :  { %223 = vrot.lane.b32.xlu2 %v1858_v60, %s2118_s0  ;;  %v339_v60 = vrot.slane %v2223_v59, 7 }
 0x1f0   :  { %v226_v61 = vpop.permute.xlu2 %225 }
 0x1f1   :  { %v230_v62 = vmul.f32 %v226_v61, %v193_v43 }
 0x1f3   :  { %v265_v63 = vpack.c.bf16 %v230_v62, %v230_v62  ;;  %v236_v1 = vrot.slane %v230_v62, 7 }
 0x1f5   :  { %v269_v2 = vunpack.c.l.b16 %v265_v63 }
 0x1f7   :  { %v270_v6 = vrot.slane %v269_v2, 7 }
 0x1f8   :  { %v224_v0 = vpop.permute.xlu2 %223 }
 0x1f9   :  { %v229_v3 = vmul.f32 %v224_v0, %v178_v51 }
 0x1fb   :  { %v264_v4 = vpack.c.bf16 %v229_v3, %v229_v3  ;;  %v2229_v5 = vsel %vm237_vm10, %v236_v1, %v229_v3 }
 0x1fd   :  { %v268_v9 = vunpack.c.l.b16 %v264_v4 }
 0x1ff   :  { %v271_v11 = vsel %vm237_vm10, %v270_v6, %v268_v9 }
 0x200   :  { %v272_v12 = vpack.c.b16 %v271_v11, %v271_v11 }
 0x202   :  { %273 = vrot.lane.b32.xlu0 %v272_v12, %s2119_s3 }
 0x274   :  { %v274_v13 = vpop.permute.xlu0 %273 }
 0x275   :  { %1787 = vmatmul.msk.bf16.vlgmr.msra.gmra.mxu3 %vm134_vm11, %v274_v13 }
 0x2f8   :  { %v287_v15 = vpop.f32.mrf.mxu3 }
 0x2f9   :  { %v292_v16 = vrot.slane %v287_v15, 7  ;;  %v296_v17 = vadd.f32 %v287_v15, %v2210_v14 }
 0x2fb   :  { %v295_v19 = vadd.f32 %v292_v16, %v2213_v18  ;;  %1859 = vtanh.f32 %v296_v17  ;;  %v1789_v23 = vmul.f32 -1.442695, %v296_v17 }
 0x2fd   :  { %1861 = vtanh.f32 %v295_v19  ;;  %v1788_v28 = vmul.f32 -1.442695, %v295_v19 }
 0x2fe   :  { %1863 = vpow2.f32 %v1789_v23 }
 0x300   :  { %v289_v20 = vpop.f32.mrf.mxu3 }
 0x301   :  { %v1860_v21 = vpop.eup %1859 }
 0x302   :  { %349 = vrot.lane.b32.xlu2 %v1860_v21, %s2118_s0 }
 0x303   :  { %v1862_v22 = vpop.eup %1861 }
 0x304   :  { %347 = vrot.lane.b32.xlu1 %v1862_v22, %s2118_s0  ;;  %v1864_v24 = vpop.eup %1863 }
 0x305   :  { %v304_v25 = vadd.f32 1.0, %v1864_v24 }
 0x307   :  { %1865 = vrcp.f32 %v304_v25  ;;  %v331_v33 = vand.u32 2147483648, %v304_v25  ;;  %vm325_vm13 = vweird.f32 %v304_v25  ;;  %v329_v35 = vand.u32 2147483647, %v304_v25 }
 0x308   :  { %1867 = vpow2.f32 %v1788_v28 }
 0x309   :  { %v332_v37 = vor.u32 1.1754944e-38, %v331_v33  ;;  %vm330_vm15 = vcmp.eq.f32.partialorder %v329_v35, 8.507059e+37 }
 0x30d   :  { %v1866_v26 = vpop.eup %1865 }
 0x30e   :  { %v321_v27 = vmul.f32 %v1866_v26, %v304_v25  ;;  %v1868_v31 = vpop.eup %1867  ;;  %vm326_vm12 = vweird.f32 %v1866_v26 }
 0x30f   :  { %v303_v34 = vadd.f32 1.0, %v1868_v31  ;;  %vm327_vm14 = vmor %vm325_vm13, %vm326_vm12 }
 0x310   :  { %v322_v29 = vsub.f32 1.0, %v321_v27 }
 0x311   :  { %1869 = vrcp.f32 %v303_v34  ;;  %v316_v46 = vand.u32 2147483648, %v303_v34  ;;  %vm310_vm1 = vweird.f32 %v303_v34  ;;  %v314_v47 = vand.u32 2147483647, %v303_v34 }
 0x312   :  { %v323_v30 = vmul.f32 %v1866_v26, %v322_v29 }
 0x313   :  { %v317_v49 = vor.u32 1.1754944e-38, %v316_v46  ;;  %vm315_vm3 = vcmp.eq.f32.partialorder %v314_v47, 8.507059e+37 }
 0x314   :  { %v324_v32 = vadd.f32 %v1866_v26, %v323_v30 }
 0x316   :  { %v328_v36 = vsel %vm327_vm14, %v1866_v26, %v324_v32 }
 0x317   :  { %v333_v39 = vsel %vm330_vm15, %v332_v37, %v328_v36  ;;  %v1870_v41 = vpop.eup %1869 }
 0x318   :  { %v306_v42 = vmul.f32 %v1870_v41, %v303_v34  ;;  %vm311_vm0 = vweird.f32 %v1870_v41  ;;  %v344_v54 = vmul.f32 %v340_v53, %v333_v39 }
 0x319   :  { %vm312_vm2 = vmor %vm310_vm1, %vm311_vm0 }
 0x31a   :  { %v307_v43 = vsub.f32 1.0, %v306_v42 }
 0x31c   :  { %v308_v44 = vmul.f32 %v1870_v41, %v307_v43 }
 0x31e   :  { %v309_v45 = vadd.f32 %v1870_v41, %v308_v44 }
 0x320   :  { %v313_v48 = vsel %vm312_vm2, %v1870_v41, %v309_v45 }
 0x321   :  { %v318_v51 = vsel %vm315_vm3, %v317_v49, %v313_v48 }
 0x322   :  { %v343_v61 = vmul.f32 %v339_v60, %v318_v51  ;;  %v2267_v60 = vld [vmem:[#allocation6 + $0x18] sm:$0xff] }
 0x323   :  { %255 = vmatpush.msra.mxu2 %v2267_v60  ;;  %542 = vmatpush.msrb.mxu1 %v2267_v60 }
 0x324   :  { %688 = vmatpush.msrb.mxu3 %v2267_v60 }
 0x35c   :  { %v350_v38 = vpop.permute.xlu2 %349 }
 0x35d   :  { %v354_v40 = vmul.f32 %v350_v38, %v333_v39 }
 0x35f   :  { %359 = vrot.lane.b32.xlu1 %v354_v40, %s2119_s3 }
 0x376   :  { %v348_v50 = vpop.permute.xlu1 %347 }
 0x377   :  { %v353_v52 = vmul.f32 %v348_v50, %v318_v51 }
 0x379   :  { %357 = vrot.lane.b32.xlu0 %v353_v52, %s2119_s3 }
 0x3d1   :  { %v360_v56 = vpop.permute.xlu1 %359 }
 0x3d2   :  { %v2241_v57 = vadd.f32 %v360_v56, %v344_v54 }
 0x3d4   :  { %1871 = vtanh.f32 %v2241_v57 }
 0x3da   :  { %v1872_v58 = vpop.eup %1871 }
 0x3db   :  { %371 = vrot.lane.b32.xlu0 %v1872_v58, %s2118_s0 }
 0x3eb   :  { %v358_v62 = vpop.permute.xlu0 %357 }
 0x3ec   :  { %v2246_v63 = vadd.f32 %v358_v62, %v343_v61  ;;  %v2271_v61 = vld [vmem:[#allocation6 + $0x10] sm:$0xff]  ;;  %v2273_v62 = vld [vmem:[#allocation6 + $0x8] sm:$0xff] }
 0x3ed   :  { %256 = vmatpush.msra.mxu2 %v2271_v61  ;;  %543 = vmatpush.msrb.mxu1 %v2271_v61 }
 0x3ee   :  { %1873 = vtanh.f32 %v2246_v63  ;;  %689 = vmatpush.msrb.mxu3 %v2271_v61 }
 0x3ef   :  { %257 = vmatpush.msra.mxu2 %v2273_v62  ;;  %544 = vmatpush.msrb.mxu1 %v2273_v62 }
 0x3f0   :  { %690 = vmatpush.msrb.mxu3 %v2273_v62 }
 0x3f4   :  { %v1874_v0 = vpop.eup %1873 }
 0x3f5   :  { %369 = vrot.lane.b32.xlu2 %v1874_v0, %s2118_s0  ;;  %v2279_v0 = vld [vmem:[#allocation6] sm:$0xff] }
 0x3f6   :  { %258 = vmatpush.msra.mxu2 %v2279_v0  ;;  %545 = vmatpush.msrb.mxu1 %v2279_v0 }
 0x3f7   :  { %691 = vmatpush.msrb.mxu3 %v2279_v0 }
 0x3f8   :  { %397 = vmatpush.msrb.mxu2 %v2267_v60  ;;  %719 = vmatpush.bf16.msra.mxu1 %v2190_v7 }
 0x3f9   :  { %834 = vmatpush.msra.mxu3 %v2267_v60 }
 0x3fa   :  { %398 = vmatpush.msrb.mxu2 %v2271_v61 }
 0x3fb   :  { %835 = vmatpush.msra.mxu3 %v2271_v61 }
 0x3fc   :  { %399 = vmatpush.msrb.mxu2 %v2273_v62  ;;  %720 = vmatpush.bf16.msra.mxu1 %v2193_v8 }
 0x3fd   :  { %836 = vmatpush.msra.mxu3 %v2273_v62 }
 0x3fe   :  { %400 = vmatpush.msrb.mxu2 %v2279_v0 }
 0x3ff   :  { %837 = vmatpush.msra.mxu3 %v2279_v0 }
 0x44d   :  { %v372_v55 = vpop.permute.xlu0 %371 }
 0x44e   :  { %v376_v1 = vmul.f32 %v372_v55, %v333_v39  ;;  %v484_v55 = vrot.slane %v2241_v57, 7 }
 0x44f   :  { %v370_v2 = vpop.permute.xlu2 %369 }
 0x450   :  { %v375_v3 = vmul.f32 %v370_v2, %v318_v51  ;;  %v408_v4 = vpack.c.bf16 %v376_v1, %v376_v1 }
 0x452   :  { %v379_v6 = vrot.slane %v375_v3, 1  ;;  %v407_v9 = vpack.c.bf16 %v375_v3, %v375_v3  ;;  %v412_v59 = vunpack.c.l.b16 %v408_v4 }
 0x454   :  { %v411_v11 = vunpack.c.l.b16 %v407_v9  ;;  %v2251_v12 = vsel %vm237_vm10, %v376_v1, %v379_v6 }
 0x456   :  { %v413_v13 = vrot.slane %v411_v11, 1 }
 0x458   :  { %v414_v15 = vsel %vm237_vm10, %v412_v59, %v413_v13 }
 0x459   :  { %v415_v16 = vpack.c.b16 %v414_v15, %v414_v15 }
 0x45b   :  { %416 = vrot.lane.b32.xlu1 %v415_v16, %s2119_s3 }
 0x4cd   :  { %v417_v17 = vpop.permute.xlu1 %416 }
 0x4ce   :  { %1791 = vmatmul.msk.bf16.vlgmr.msrb.gmra.mxu0 %vm134_vm11, %v417_v17 }
 0x4cf   :  { %1272 = vmatpush.msrb.mxu0 %v2267_v60 }
 0x4d1   :  { %1273 = vmatpush.msrb.mxu0 %v2271_v61 }
 0x4d3   :  { %1274 = vmatpush.msrb.mxu0 %v2273_v62 }
 0x4d5   :  { %1275 = vmatpush.msrb.mxu0 %v2279_v0 }
 0x54b   :  { %v430_v19 = vpop.f32.mrf.mxu0 }
 0x54c   :  { %v435_v20 = vrot.slane %v430_v19, 6  ;;  %v436_v21 = vrot.slane %v430_v19, 7 }
 0x54e   :  { %v439_v22 = vadd.f32 %v435_v20, %v2213_v18  ;;  %v440_v23 = vadd.f32 %v436_v21, %v2210_v14 }
 0x550   :  { %1875 = vtanh.f32 %v439_v22  ;;  %v1792_v27 = vmul.f32 -1.442695, %v439_v22  ;;  %v1793_v31 = vmul.f32 -1.442695, %v440_v23 }
 0x551   :  { %1877 = vtanh.f32 %v440_v23 }
 0x552   :  { %1879 = vpow2.f32 %v1792_v27 }
 0x553   :  { %v432_v24 = vpop.f32.mrf.mxu0 }
 0x556   :  { %v1876_v25 = vpop.eup %1875 }
 0x557   :  { %v1878_v26 = vpop.eup %1877  ;;  %491 = vrot.lane.b32.xlu2 %v1876_v25, %s2118_s0 }
 0x558   :  { %493 = vrot.lane.b32.xlu0 %v1878_v26, %s2118_s0  ;;  %v1880_v28 = vpop.eup %1879 }
 0x559   :  { %v447_v29 = vadd.f32 1.0, %v1880_v28 }
 0x55b   :  { %1881 = vrcp.f32 %v447_v29  ;;  %v460_v38 = vand.u32 2147483648, %v447_v29  ;;  %vm454_vm5 = vweird.f32 %v447_v29  ;;  %v458_v39 = vand.u32 2147483647, %v447_v29 }
 0x55c   :  { %1883 = vpow2.f32 %v1793_v31 }
 0x55d   :  { %v461_v41 = vor.u32 1.1754944e-38, %v460_v38  ;;  %vm459_vm7 = vcmp.eq.f32.partialorder %v458_v39, 8.507059e+37 }
 0x561   :  { %v1882_v30 = vpop.eup %1881 }
 0x562   :  { %v450_v32 = vmul.f32 %v1882_v30, %v447_v29  ;;  %v1884_v35 = vpop.eup %1883  ;;  %vm455_vm4 = vweird.f32 %v1882_v30  ;;  %v2329_v29 = vld [vmem:[%s2541_s6] ss:$0 sm:$0xff] }
 0x563   :  { %v448_v36 = vadd.f32 1.0, %v1884_v35  ;;  %vm456_vm6 = vmor %vm454_vm5, %vm455_vm4 }
 0x564   :  { %v451_v33 = vsub.f32 1.0, %v450_v32 }
 0x565   :  { %1885 = vrcp.f32 %v448_v36  ;;  %v475_v50 = vand.u32 2147483648, %v448_v36  ;;  %vm469_vm9 = vweird.f32 %v448_v36  ;;  %v473_v51 = vand.u32 2147483647, %v448_v36 }
 0x566   :  { %v452_v34 = vmul.f32 %v1882_v30, %v451_v33 }
 0x567   :  { %v476_v53 = vor.u32 1.1754944e-38, %v475_v50  ;;  %vm474_vm13 = vcmp.eq.f32.partialorder %v473_v51, 8.507059e+37 }
 0x568   :  { %v453_v37 = vadd.f32 %v1882_v30, %v452_v34 }
 0x56a   :  { %v457_v40 = vsel %vm456_vm6, %v1882_v30, %v453_v37 }
 0x56b   :  { %v2260_v43 = vsel %vm459_vm7, %v461_v41, %v457_v40  ;;  %v1886_v45 = vpop.eup %1885 }
 0x56c   :  { %v465_v46 = vmul.f32 %v1886_v45, %v448_v36  ;;  %vm470_vm8 = vweird.f32 %v1886_v45 }
 0x56d   :  { %vm471_vm12 = vmor %vm469_vm9, %vm470_vm8 }
 0x56e   :  { %v466_v47 = vsub.f32 1.0, %v465_v46 }
 0x570   :  { %v467_v48 = vmul.f32 %v1886_v45, %v466_v47 }
 0x572   :  { %v468_v49 = vadd.f32 %v1886_v45, %v467_v48 }
 0x574   :  { %v472_v52 = vsel %vm471_vm12, %v1886_v45, %v468_v49 }
 0x575   :  { %v477_v56 = vsel %vm474_vm13, %v476_v53, %v472_v52 }
 0x576   :  { %v488_v2 = vmul.f32 %v484_v55, %v477_v56 }
 0x5b1   :  { %v492_v42 = vpop.permute.xlu2 %491 }
 0x5b2   :  { %v497_v44 = vmul.f32 %v492_v42, %v2260_v43 }
 0x5b4   :  { %501 = vrot.lane.b32.xlu1 %v497_v44, %s2119_s3 }
 0x5ca   :  { %v494_v54 = vpop.permute.xlu0 %493 }
 0x5cb   :  { %v498_v58 = vmul.f32 %v494_v54, %v477_v56 }
 0x5cd   :  { %503 = vrot.lane.b32.xlu2 %v498_v58, %s2119_s3 }
 0x5d5   :  { %239 = vrot.lane.b32.xlu2 %v2229_v5, %s2119_s3  ;;  %v483_v5 = vrot.slane %v2246_v63, 7 }
 0x5d7   :  { %v487_v1 = vmul.f32 %v483_v5, %v2260_v43 }
 0x626   :  { %v502_v3 = vpop.permute.xlu1 %501 }
 0x627   :  { %v504_v4 = vpop.permute.xlu2 %503  ;;  %v2304_v6 = vadd.f32 %v502_v3, %v487_v1 }
 0x628   :  { %v2306_v9 = vadd.f32 %v504_v4, %v488_v2 }
 0x629   :  { %1887 = vtanh.f32 %v2304_v6 }
 0x62a   :  { %1889 = vtanh.f32 %v2306_v9 }
 0x62f   :  { %v1888_v11 = vpop.eup %1887  ;;  %v240_v59 = vpop.permute.xlu2 %239 }
 0x630   :  { %v1890_v13 = vpop.eup %1889  ;;  %1786 = vmatmul.msk.f32.vlgmr.msra.gmra.mxu2 %vm134_vm11, %v240_v59  ;;  %513 = vrot.lane.b32.xlu0 %v1888_v11, %s2118_s0 }
 0x631   :  { %515 = vrot.lane.b32.xlu1 %v1890_v13, %s2118_s0  ;;  %573 = vmatpush.bf16.msra.mxu2 %v2190_v7 }
 0x635   :  { %574 = vmatpush.bf16.msra.mxu2 %v2193_v8 }
 0x638   :  { %381 = vrot.lane.b32.xlu0 %v2251_v12, %s2119_s3 }
 0x6a2   :  { %v514_v57 = vpop.permute.xlu0 %513 }
 0x6a3   :  { %v516_v63 = vpop.permute.xlu1 %515  ;;  %v519_v15 = vmul.f32 %v514_v57, %v2260_v43 }
 0x6a4   :  { %v520_v16 = vmul.f32 %v516_v63, %v477_v56 }
 0x6a5   :  { %v523_v17 = vrot.slane %v519_v15, 2  ;;  %v552_v19 = vpack.c.bf16 %v519_v15, %v519_v15 }
 0x6a6   :  { %v524_v20 = vrot.slane %v520_v16, 1  ;;  %v553_v21 = vpack.c.bf16 %v520_v16, %v520_v16 }
 0x6a7   :  { %v556_v22 = vunpack.c.l.b16 %v552_v19 }
 0x6a8   :  { %v557_v23 = vunpack.c.l.b16 %v553_v21  ;;  %v2319_v24 = vsel %vm237_vm10, %v524_v20, %v523_v17  ;;  %v629_v21 = vrot.slane %v2304_v6, 7 }
 0x6a9   :  { %v558_v25 = vrot.slane %v556_v22, 2  ;;  %v630_v22 = vrot.slane %v2306_v9, 7 }
 0x6aa   :  { %v559_v26 = vrot.slane %v557_v23, 1  ;;  %v382_v27 = vpop.permute.xlu0 %381 }
 0x6ab   :  { %1790 = vmatmul.msk.f32.vlgmr.msrb.gmra.mxu2 %vm134_vm11, %v382_v27 }
 0x6ac   :  { %v560_v12 = vsel %vm237_vm10, %v559_v26, %v558_v25  ;;  %980 = vmatpush.msrb.mxu2 %v2267_v60 }
 0x6ad   :  { %v561_v28 = vpack.c.b16 %v560_v12, %v560_v12 }
 0x6ae   :  { %981 = vmatpush.msrb.mxu2 %v2271_v61 }
 0x6af   :  { %562 = vrot.lane.b32.xlu1 %v561_v28, %s2119_s3 }
 0x6b0   :  { %982 = vmatpush.msrb.mxu2 %v2273_v62 }
 0x6b2   :  { %983 = vmatpush.msrb.mxu2 %v2279_v0 }
 0x6b3   :  { %v260_v30 = vpop.f32.mrf.mxu2 }
 0x6b4   :  { %v261_v31 = vadd.f32 %v2329_v29, %v260_v30 }
 0x6b6   :  { %263 = vst [vmem:[#allocation2] sm:$0x3] %v261_v31 }
 0x721   :  { %v563_v32 = vpop.permute.xlu1 %562 }
 0x722   :  { %1795 = vmatmul.msk.bf16.vlgmr.msra.gmra.mxu2 %vm134_vm11, %v563_v32 }
 0x723   :  { %1157 = vmatpush.bf16.msra.mxu2 %v2190_v7 }
 0x727   :  { %1158 = vmatpush.bf16.msra.mxu2 %v2193_v8 }
 0x72e   :  { %v402_v33 = vpop.f32.mrf.mxu2 }
 0x72f   :  { %v403_v34 = vadd.f32 %v2329_v29, %v402_v33 }
 0x731   :  { %406 = vst [vmem:[#allocation2 + $0x2] sm:$0x3] %v403_v34 }
 0x7a5   :  { %v576_v35 = vpop.f32.mrf.mxu2 }
 0x7a6   :  { %v581_v36 = vrot.slane %v576_v35, 5  ;;  %v582_v37 = vrot.slane %v576_v35, 6 }
 0x7a8   :  { %v585_v38 = vadd.f32 %v581_v36, %v2213_v18  ;;  %v586_v39 = vadd.f32 %v582_v37, %v2210_v14 }
 0x7aa   :  { %1891 = vtanh.f32 %v585_v38  ;;  %v1796_v43 = vmul.f32 -1.442695, %v585_v38  ;;  %v1797_v47 = vmul.f32 -1.442695, %v586_v39 }
 0x7ab   :  { %1893 = vtanh.f32 %v586_v39 }
 0x7ac   :  { %1895 = vpow2.f32 %v1796_v43 }
 0x7ad   :  { %v578_v40 = vpop.f32.mrf.mxu2 }
 0x7b0   :  { %v1892_v41 = vpop.eup %1891 }
 0x7b1   :  { %v1894_v42 = vpop.eup %1893  ;;  %637 = vrot.lane.b32.xlu2 %v1892_v41, %s2118_s0 }
 0x7b2   :  { %639 = vrot.lane.b32.xlu0 %v1894_v42, %s2118_s0  ;;  %v1896_v44 = vpop.eup %1895 }
 0x7b3   :  { %v593_v45 = vadd.f32 1.0, %v1896_v44 }
 0x7b5   :  { %1897 = vrcp.f32 %v593_v45  ;;  %v606_v54 = vand.u32 2147483648, %v593_v45  ;;  %vm600_vm15 = vweird.f32 %v593_v45  ;;  %v604_v56 = vand.u32 2147483647, %v593_v45 }
 0x7b6   :  { %1899 = vpow2.f32 %v1797_v47 }
 0x7b7   :  { %v607_v5 = vor.u32 1.1754944e-38, %v606_v54  ;;  %vm605_vm1 = vcmp.eq.f32.partialorder %v604_v56, 8.507059e+37 }
 0x7bb   :  { %v1898_v46 = vpop.eup %1897 }
 0x7bc   :  { %v596_v48 = vmul.f32 %v1898_v46, %v593_v45  ;;  %v1900_v51 = vpop.eup %1899  ;;  %vm601_vm14 = vweird.f32 %v1898_v46 }
 0x7bd   :  { %v594_v52 = vadd.f32 1.0, %v1900_v51  ;;  %vm602_vm0 = vmor %vm600_vm15, %vm601_vm14 }
 0x7be   :  { %v597_v49 = vsub.f32 1.0, %v596_v48 }
 0x7bf   :  { %1901 = vrcp.f32 %v594_v52  ;;  %v621_v57 = vand.u32 2147483648, %v594_v52  ;;  %vm615_vm3 = vweird.f32 %v594_v52  ;;  %v619_v63 = vand.u32 2147483647, %v594_v52 }
 0x7c0   :  { %v598_v50 = vmul.f32 %v1898_v46, %v597_v49 }
 0x7c1   :  { %v622_v16 = vor.u32 1.1754944e-38, %v621_v57  ;;  %vm620_vm5 = vcmp.eq.f32.partialorder %v619_v63, 8.507059e+37 }
 0x7c2   :  { %v599_v53 = vadd.f32 %v1898_v46, %v598_v50 }
 0x7c4   :  { %v603_v58 = vsel %vm602_vm0, %v1898_v46, %v599_v53 }
 0x7c5   :  { %v608_v1 = vsel %vm605_vm1, %v607_v5, %v603_v58  ;;  %v1902_v3 = vpop.eup %1901 }
 0x7c6   :  { %v611_v4 = vmul.f32 %v1902_v3, %v594_v52  ;;  %vm616_vm2 = vweird.f32 %v1902_v3  ;;  %v633_v23 = vmul.f32 %v629_v21, %v608_v1 }
 0x7c7   :  { %vm617_vm4 = vmor %vm615_vm3, %vm616_vm2 }
 0x7c8   :  { %v612_v11 = vsub.f32 1.0, %v611_v4 }
 0x7ca   :  { %v613_v59 = vmul.f32 %v1902_v3, %v612_v11 }
 0x7cc   :  { %v614_v13 = vadd.f32 %v1902_v3, %v613_v59 }
 0x7ce   :  { %v618_v15 = vsel %vm617_vm4, %v1902_v3, %v614_v13 }
 0x7cf   :  { %v623_v19 = vsel %vm620_vm5, %v622_v16, %v618_v15 }
 0x7d0   :  { %v634_v25 = vmul.f32 %v630_v22, %v623_v19 }
 0x80b   :  { %v638_v55 = vpop.permute.xlu2 %637 }
 0x80c   :  { %v643_v2 = vmul.f32 %v638_v55, %v608_v1 }
 0x80e   :  { %647 = vrot.lane.b32.xlu1 %v643_v2, %s2119_s3 }
 0x824   :  { %v640_v17 = vpop.permute.xlu0 %639 }
 0x825   :  { %v644_v20 = vmul.f32 %v640_v17, %v623_v19 }
 0x827   :  { %649 = vrot.lane.b32.xlu2 %v644_v20, %s2119_s3 }
 0x82f   :  { %526 = vrot.lane.b32.xlu2 %v2319_v24, %s2119_s3 }
 0x880   :  { %v648_v26 = vpop.permute.xlu1 %647 }
 0x881   :  { %v650_v27 = vpop.permute.xlu2 %649  ;;  %v2348_v12 = vadd.f32 %v648_v26, %v633_v23 }
 0x882   :  { %v2350_v28 = vadd.f32 %v650_v27, %v634_v25 }
 0x883   :  { %1903 = vtanh.f32 %v2348_v12 }
 0x884   :  { %1905 = vtanh.f32 %v2350_v28 }
 0x889   :  { %v1904_v30 = vpop.eup %1903  ;;  %v527_v31 = vpop.permute.xlu2 %526 }
 0x88a   :  { %v1906_v32 = vpop.eup %1905  ;;  %1794 = vmatmul.msk.f32.vlgmr.msrb.gmra.mxu1 %vm134_vm11, %v527_v31  ;;  %659 = vrot.lane.b32.xlu0 %v1904_v30, %s2118_s0 }
 0x88b   :  { %661 = vrot.lane.b32.xlu1 %v1906_v32, %s2118_s0  ;;  %1126 = vmatpush.msrb.mxu1 %v2267_v60 }
 0x88d   :  { %1127 = vmatpush.msrb.mxu1 %v2271_v61 }
 0x88f   :  { %1128 = vmatpush.msrb.mxu1 %v2273_v62 }
 0x891   :  { %1129 = vmatpush.msrb.mxu1 %v2279_v0 }
 0x8fc   :  { %v660_v6 = vpop.permute.xlu0 %659 }
 0x8fd   :  { %v662_v9 = vpop.permute.xlu1 %661  ;;  %v665_v24 = vmul.f32 %v660_v6, %v608_v1  ;;  %v776_v6 = vrot.slane %v2350_v28, 7 }
 0x8fe   :  { %v666_v33 = vmul.f32 %v662_v9, %v623_v19 }
 0x8ff   :  { %v669_v34 = vrot.slane %v665_v24, 3  ;;  %v698_v35 = vpack.c.bf16 %v665_v24, %v665_v24 }
 0x900   :  { %v670_v36 = vrot.slane %v666_v33, 2  ;;  %v699_v37 = vpack.c.bf16 %v666_v33, %v666_v33 }
 0x901   :  { %v702_v38 = vunpack.c.l.b16 %v698_v35  ;;  %v775_v35 = vrot.slane %v2348_v12, 7 }
 0x902   :  { %v703_v39 = vunpack.c.l.b16 %v699_v37  ;;  %v2362_v40 = vsel %vm237_vm10, %v670_v36, %v669_v34 }
 0x903   :  { %v704_v60 = vrot.slane %v702_v38, 3 }
 0x904   :  { %v705_v41 = vrot.slane %v703_v39, 2 }
 0x906   :  { %v706_v61 = vsel %vm237_vm10, %v705_v41, %v704_v60 }
 0x907   :  { %v547_v62 = vpop.f32.mrf.mxu1  ;;  %v707_v42 = vpack.c.b16 %v706_v61, %v706_v61 }
 0x908   :  { %v548_v0 = vadd.f32 %v2329_v29, %v547_v62 }
 0x909   :  { %708 = vrot.lane.b32.xlu0 %v707_v42, %s2119_s3 }
 0x90a   :  { %551 = vst [vmem:[#allocation2 + $0x4] sm:$0x3] %v548_v0 }
 0x97b   :  { %v709_v43 = vpop.permute.xlu0 %708 }
 0x97c   :  { %1799 = vmatmul.msk.bf16.vlgmr.msra.gmra.mxu1 %vm134_vm11, %v709_v43 }
 0x9f9   :  { %v722_v44 = vpop.f32.mrf.mxu1 }
 0x9fa   :  { %v727_v45 = vrot.slane %v722_v44, 4  ;;  %v728_v46 = vrot.slane %v722_v44, 5 }
 0x9fc   :  { %v731_v47 = vadd.f32 %v727_v45, %v2213_v18  ;;  %v732_v48 = vadd.f32 %v728_v46, %v2210_v14 }
 0x9fe   :  { %1907 = vtanh.f32 %v731_v47  ;;  %v1801_v52 = vmul.f32 -1.442695, %v732_v48  ;;  %v1800_v58 = vmul.f32 -1.442695, %v731_v47 }
 0x9ff   :  { %1909 = vtanh.f32 %v732_v48 }
 0xa00   :  { %1911 = vpow2.f32 %v1801_v52 }
 0xa01   :  { %v724_v49 = vpop.f32.mrf.mxu1 }
 0xa04   :  { %v1908_v50 = vpop.eup %1907 }
 0xa05   :  { %v1910_v51 = vpop.eup %1909  ;;  %783 = vrot.lane.b32.xlu1 %v1908_v50, %s2118_s0 }
 0xa06   :  { %785 = vrot.lane.b32.xlu2 %v1910_v51, %s2118_s0  ;;  %v1912_v53 = vpop.eup %1911 }
 0xa07   :  { %v740_v54 = vadd.f32 1.0, %v1912_v53 }
 0xa09   :  { %1913 = vrcp.f32 %v740_v54  ;;  %v767_v11 = vand.u32 2147483648, %v740_v54  ;;  %vm761_vm7 = vweird.f32 %v740_v54  ;;  %v765_v59 = vand.u32 2147483647, %v740_v54 }
 0xa0a   :  { %1915 = vpow2.f32 %v1800_v58 }
 0xa0b   :  { %v768_v57 = vor.u32 1.1754944e-38, %v767_v11  ;;  %vm766_vm9 = vcmp.eq.f32.partialorder %v765_v59, 8.507059e+37 }
 0xa0f   :  { %v1914_v56 = vpop.eup %1913 }
 0xa10   :  { %v757_v5 = vmul.f32 %v1914_v56, %v740_v54  ;;  %v1916_v1 = vpop.eup %1915  ;;  %vm762_vm6 = vweird.f32 %v1914_v56 }
 0xa11   :  { %v739_v3 = vadd.f32 1.0, %v1916_v1  ;;  %vm763_vm8 = vmor %vm761_vm7, %vm762_vm6 }
 0xa12   :  { %v758_v55 = vsub.f32 1.0, %v757_v5 }
 0xa13   :  { %1917 = vrcp.f32 %v739_v3  ;;  %v752_v23 = vand.u32 2147483648, %v739_v3  ;;  %vm746_vm13 = vweird.f32 %v739_v3  ;;  %v750_v25 = vand.u32 2147483647, %v739_v3 }
 0xa14   :  { %v759_v2 = vmul.f32 %v1914_v56, %v758_v55 }
 0xa15   :  { %v753_v27 = vor.u32 1.1754944e-38, %v752_v23  ;;  %vm751_vm15 = vcmp.eq.f32.partialorder %v750_v25, 8.507059e+37 }
 0xa16   :  { %v760_v4 = vadd.f32 %v1914_v56, %v759_v2 }
 0xa18   :  { %v764_v13 = vsel %vm763_vm8, %v1914_v56, %v760_v4 }
 0xa19   :  { %v769_v15 = vsel %vm766_vm9, %v768_v57, %v764_v13  ;;  %v1918_v16 = vpop.eup %1917 }
 0xa1a   :  { %v742_v19 = vmul.f32 %v1918_v16, %v739_v3  ;;  %vm747_vm12 = vweird.f32 %v1918_v16  ;;  %v780_v9 = vmul.f32 %v776_v6, %v769_v15 }
 0xa1b   :  { %vm748_vm14 = vmor %vm746_vm13, %vm747_vm12 }
 0xa1c   :  { %v743_v20 = vsub.f32 1.0, %v742_v19 }
 0xa1e   :  { %v744_v21 = vmul.f32 %v1918_v16, %v743_v20 }
 0xa20   :  { %v745_v22 = vadd.f32 %v1918_v16, %v744_v21 }
 0xa22   :  { %v749_v26 = vsel %vm748_vm14, %v1918_v16, %v745_v22 }
 0xa23   :  { %v754_v31 = vsel %vm751_vm15, %v753_v27, %v749_v26 }
 0xa24   :  { %v779_v36 = vmul.f32 %v775_v35, %v754_v31 }
 0xa60   :  { %v786_v63 = vpop.permute.xlu2 %785 }
 0xa61   :  { %v790_v17 = vmul.f32 %v786_v63, %v769_v15 }
 0xa63   :  { %795 = vrot.lane.b32.xlu1 %v790_v17, %s2119_s3 }
 0xa77   :  { %v784_v30 = vpop.permute.xlu1 %783 }
 0xa78   :  { %v789_v32 = vmul.f32 %v784_v30, %v754_v31 }
 0xa7a   :  { %793 = vrot.lane.b32.xlu0 %v789_v32, %s2119_s3 }
 0xad5   :  { %v796_v24 = vpop.permute.xlu1 %795 }
 0xad6   :  { %v2375_v33 = vadd.f32 %v796_v24, %v780_v9 }
 0xad8   :  { %1919 = vtanh.f32 %v2375_v33 }
 0xade   :  { %v1920_v34 = vpop.eup %1919 }
 0xadf   :  { %807 = vrot.lane.b32.xlu0 %v1920_v34, %s2118_s0 }
 0xaec   :  { %v794_v37 = vpop.permute.xlu0 %793 }
 0xaed   :  { %v2380_v38 = vadd.f32 %v794_v37, %v779_v36 }
 0xaef   :  { %1921 = vtanh.f32 %v2380_v38 }
 0xaf5   :  { %v1922_v39 = vpop.eup %1921 }
 0xaf6   :  { %805 = vrot.lane.b32.xlu2 %v1922_v39, %s2118_s0  ;;  %v921_v39 = vrot.slane %v2380_v38, 7 }
 0xb50   :  { %v806_v28 = vpop.permute.xlu2 %805 }
 0xb51   :  { %v808_v60 = vpop.permute.xlu0 %807  ;;  %v811_v41 = vmul.f32 %v806_v28, %v754_v31  ;;  %v922_v28 = vrot.slane %v2375_v33, 7 }
 0xb52   :  { %v812_v61 = vmul.f32 %v808_v60, %v769_v15 }
 0xb53   :  { %v815_v62 = vrot.slane %v811_v41, 4  ;;  %v844_v42 = vpack.c.bf16 %v811_v41, %v811_v41 }
 0xb54   :  { %v816_v0 = vrot.slane %v812_v61, 3  ;;  %v845_v43 = vpack.c.bf16 %v812_v61, %v812_v61 }
 0xb55   :  { %v848_v44 = vunpack.c.l.b16 %v844_v42 }
 0xb56   :  { %v849_v45 = vunpack.c.l.b16 %v845_v43  ;;  %v2385_v12 = vsel %vm237_vm10, %v816_v0, %v815_v62 }
 0xb57   :  { %v850_v46 = vrot.slane %v848_v44, 4 }
 0xb58   :  { %v851_v47 = vrot.slane %v849_v45, 3 }
 0xb5a   :  { %v852_v48 = vsel %vm237_vm10, %v851_v47, %v850_v46 }
 0xb5b   :  { %v853_v49 = vpack.c.b16 %v852_v48, %v852_v48 }
 0xb5d   :  { %854 = vrot.lane.b32.xlu1 %v853_v49, %s2119_s3 }
 0xbcf   :  { %v855_v50 = vpop.permute.xlu1 %854 }
 0xbd0   :  { %1803 = vmatmul.msk.bf16.vlgmr.msra.gmra.mxu0 %vm134_vm11, %v855_v50 }
 0xc4d   :  { %v868_v51 = vpop.f32.mrf.mxu0 }
 0xc4e   :  { %v873_v52 = vrot.slane %v868_v51, 3  ;;  %v874_v53 = vrot.slane %v868_v51, 4 }
 0xc50   :  { %v877_v54 = vadd.f32 %v873_v52, %v2213_v18  ;;  %v878_v56 = vadd.f32 %v874_v53, %v2210_v14 }
 0xc52   :  { %1923 = vtanh.f32 %v877_v54  ;;  %v1804_v1 = vmul.f32 -1.442695, %v877_v54  ;;  %v1805_v11 = vmul.f32 -1.442695, %v878_v56 }
 0xc53   :  { %1925 = vtanh.f32 %v878_v56 }
 0xc54   :  { %1927 = vpow2.f32 %v1804_v1 }
 0xc55   :  { %v870_v58 = vpop.f32.mrf.mxu0 }
 0xc58   :  { %v1924_v5 = vpop.eup %1923 }
 0xc59   :  { %v1926_v55 = vpop.eup %1925  ;;  %929 = vrot.lane.b32.xlu2 %v1924_v5, %s2118_s0 }
 0xc5a   :  { %931 = vrot.lane.b32.xlu0 %v1926_v55, %s2118_s0  ;;  %v1928_v2 = vpop.eup %1927 }
 0xc5b   :  { %v885_v3 = vadd.f32 1.0, %v1928_v2 }
 0xc5d   :  { %1929 = vrcp.f32 %v885_v3  ;;  %v898_v17 = vand.u32 2147483648, %v885_v3  ;;  %vm892_vm1 = vweird.f32 %v885_v3  ;;  %v896_v19 = vand.u32 2147483647, %v885_v3 }
 0xc5e   :  { %1931 = vpow2.f32 %v1805_v11 }
 0xc5f   :  { %v899_v21 = vor.u32 1.1754944e-38, %v898_v17  ;;  %vm897_vm3 = vcmp.eq.f32.partialorder %v896_v19, 8.507059e+37 }
 0xc63   :  { %v1930_v4 = vpop.eup %1929 }
 0xc64   :  { %v888_v59 = vmul.f32 %v1930_v4, %v885_v3  ;;  %v1932_v63 = vpop.eup %1931  ;;  %vm893_vm0 = vweird.f32 %v1930_v4 }
 0xc65   :  { %v886_v15 = vadd.f32 1.0, %v1932_v63  ;;  %vm894_vm2 = vmor %vm892_vm1, %vm893_vm0 }
 0xc66   :  { %v889_v13 = vsub.f32 1.0, %v888_v59 }
 0xc67   :  { %1933 = vrcp.f32 %v886_v15  ;;  %v913_v6 = vand.u32 2147483648, %v886_v15  ;;  %vm907_vm5 = vweird.f32 %v886_v15  ;;  %v911_v9 = vand.u32 2147483647, %v886_v15 }
 0xc68   :  { %v890_v57 = vmul.f32 %v1930_v4, %v889_v13 }
 0xc69   :  { %v914_v34 = vor.u32 1.1754944e-38, %v913_v6  ;;  %vm912_vm7 = vcmp.eq.f32.partialorder %v911_v9, 8.507059e+37 }
 0xc6a   :  { %v891_v16 = vadd.f32 %v1930_v4, %v890_v57 }
 0xc6c   :  { %v895_v20 = vsel %vm894_vm2, %v1930_v4, %v891_v16 }
 0xc6d   :  { %v900_v23 = vsel %vm897_vm3, %v899_v21, %v895_v20  ;;  %v1934_v26 = vpop.eup %1933 }
 0xc6e   :  { %v903_v27 = vmul.f32 %v1934_v26, %v886_v15  ;;  %vm908_vm4 = vweird.f32 %v1934_v26  ;;  %v925_v60 = vmul.f32 %v921_v39, %v900_v23 }
 0xc6f   :  { %vm909_vm6 = vmor %vm907_vm5, %vm908_vm4 }
 0xc70   :  { %v904_v30 = vsub.f32 1.0, %v903_v27 }
 0xc72   :  { %v905_v31 = vmul.f32 %v1934_v26, %v904_v30 }
 0xc74   :  { %v906_v32 = vadd.f32 %v1934_v26, %v905_v31 }
 0xc76   :  { %v910_v24 = vsel %vm909_vm6, %v1934_v26, %v906_v32 }
 0xc77   :  { %v915_v36 = vsel %vm912_vm7, %v914_v34, %v910_v24 }
 0xc78   :  { %v926_v41 = vmul.f32 %v922_v28, %v915_v36 }
 0xcb3   :  { %v930_v22 = vpop.permute.xlu2 %929 }
 0xcb4   :  { %v935_v25 = vmul.f32 %v930_v22, %v900_v23 }
 0xcb6   :  { %939 = vrot.lane.b32.xlu1 %v935_v25, %s2119_s3 }
 0xccc   :  { %v932_v35 = vpop.permute.xlu0 %931 }
 0xccd   :  { %v936_v37 = vmul.f32 %v932_v35, %v915_v36 }
 0xccf   :  { %941 = vrot.lane.b32.xlu2 %v936_v37, %s2119_s3 }
 0xcd7   :  { %672 = vrot.lane.b32.xlu2 %v2362_v40, %s2119_s3 }
 0xd28   :  { %v940_v61 = vpop.permute.xlu1 %939 }
 0xd29   :  { %v942_v62 = vpop.permute.xlu2 %941  ;;  %v2400_v42 = vadd.f32 %v940_v61, %v925_v60 }
 0xd2a   :  { %v2402_v0 = vadd.f32 %v942_v62, %v926_v41 }
 0xd2b   :  { %1935 = vtanh.f32 %v2400_v42 }
 0xd2c   :  { %1937 = vtanh.f32 %v2402_v0 }
 0xd31   :  { %v1936_v43 = vpop.eup %1935  ;;  %v673_v44 = vpop.permute.xlu2 %672 }
 0xd32   :  { %v1938_v45 = vpop.eup %1937  ;;  %1798 = vmatmul.msk.f32.vlgmr.msrb.gmra.mxu3 %vm134_vm11, %v673_v44  ;;  %951 = vrot.lane.b32.xlu0 %v1936_v43, %s2118_s0 }
 0xd33   :  { %953 = vrot.lane.b32.xlu1 %v1938_v45, %s2118_s0  ;;  %1011 = vmatpush.bf16.msrb.mxu3 %v2190_v7 }
 0xd37   :  { %1012 = vmatpush.bf16.msrb.mxu3 %v2193_v8 }
 0xd3a   :  { %818 = vrot.lane.b32.xlu0 %v2385_v12, %s2119_s3 }
 0xda4   :  { %v952_v40 = vpop.permute.xlu0 %951 }
 0xda5   :  { %v954_v33 = vpop.permute.xlu1 %953  ;;  %v957_v38 = vmul.f32 %v952_v40, %v900_v23 }
 0xda6   :  { %v958_v46 = vmul.f32 %v954_v33, %v915_v36  ;;  %v1067_v33 = vrot.slane %v2400_v42, 7 }
 0xda7   :  { %v961_v47 = vrot.slane %v957_v38, 5  ;;  %v990_v48 = vpack.c.bf16 %v957_v38, %v957_v38  ;;  %v1068_v38 = vrot.slane %v2402_v0, 7 }
 0xda8   :  { %v962_v49 = vrot.slane %v958_v46, 4  ;;  %v991_v50 = vpack.c.bf16 %v958_v46, %v958_v46 }
 0xda9   :  { %v994_v51 = vunpack.c.l.b16 %v990_v48 }
 0xdaa   :  { %v995_v52 = vunpack.c.l.b16 %v991_v50  ;;  %v2414_v53 = vsel %vm237_vm10, %v962_v49, %v961_v47 }
 0xdab   :  { %v996_v54 = vrot.slane %v994_v51, 5 }
 0xdac   :  { %v997_v7 = vrot.slane %v995_v52, 4  ;;  %v819_v56 = vpop.permute.xlu0 %818 }
 0xdad   :  { %1802 = vmatmul.msk.f32.vlgmr.msra.gmra.mxu3 %vm134_vm11, %v819_v56 }
 0xdae   :  { %v998_v8 = vsel %vm237_vm10, %v997_v7, %v996_v54 }
 0xdaf   :  { %v999_v12 = vpack.c.b16 %v998_v8, %v998_v8 }
 0xdb1   :  { %1000 = vrot.lane.b32.xlu1 %v999_v12, %s2119_s3 }
 0xdb5   :  { %v693_v58 = vpop.f32.mrf.mxu3 }
 0xdb6   :  { %v694_v5 = vadd.f32 %v2329_v29, %v693_v58 }
 0xdb8   :  { %697 = vst [vmem:[#allocation2 + $0x6] sm:$0x3] %v694_v5 }
 0xe23   :  { %v1001_v55 = vpop.permute.xlu1 %1000 }
 0xe24   :  { %1807 = vmatmul.msk.bf16.vlgmr.msrb.gmra.mxu3 %vm134_vm11, %v1001_v55 }
 0xe30   :  { %v839_v1 = vpop.f32.mrf.mxu3 }
 0xe31   :  { %v840_v2 = vadd.f32 %v2329_v29, %v839_v1 }
 0xe33   :  { %843 = vst [vmem:[#allocation2 + $0x8] sm:$0x3] %v840_v2 }
 0xea7   :  { %v1014_v3 = vpop.f32.mrf.mxu3 }
 0xea8   :  { %v1019_v4 = vrot.slane %v1014_v3, 2  ;;  %v1020_v11 = vrot.slane %v1014_v3, 3 }
 0xeaa   :  { %v1023_v59 = vadd.f32 %v1019_v4, %v2213_v18  ;;  %v1024_v13 = vadd.f32 %v1020_v11, %v2210_v14 }
 0xeac   :  { %1939 = vtanh.f32 %v1023_v59  ;;  %v1808_v16 = vmul.f32 -1.442695, %v1023_v59  ;;  %v1809_v21 = vmul.f32 -1.442695, %v1024_v13  ;;  %v1284_v59 = vld [vmem:[#allocation8 + $0x10] sm:$0xff] }
 0xead   :  { %1941 = vtanh.f32 %v1024_v13  ;;  %v1285_v13 = vld [vmem:[#allocation8 + $0x18] sm:$0xff] }
 0xeae   :  { %1943 = vpow2.f32 %v1808_v16 }
 0xeaf   :  { %v1016_v57 = vpop.f32.mrf.mxu3 }
 0xeb0   :  { %v2441_v57 = vpack.c.bf16 %v1285_v13, %v1284_v59 }
 0xeb2   :  { %v1940_v63 = vpop.eup %1939  ;;  %1295 = vmatpush.bf16.msra.mxu1 %v2441_v57  ;;  %1354 = vmatpush.bf16.msra.mxu3 %v2441_v57 }
 0xeb3   :  { %v1942_v15 = vpop.eup %1941  ;;  %1075 = vrot.lane.b32.xlu2 %v1940_v63, %s2118_s0  ;;  %v1282_v63 = vld [vmem:[#allocation8] sm:$0xff]  ;;  %1413 = vmatpush.bf16.msra.mxu0 %v2441_v57 }
 0xeb4   :  { %1077 = vrot.lane.b32.xlu0 %v1942_v15, %s2118_s0  ;;  %v1944_v17 = vpop.eup %1943  ;;  %v1283_v15 = vld [vmem:[#allocation8 + $0x8] sm:$0xff] }
 0xeb5   :  { %v1031_v19 = vadd.f32 1.0, %v1944_v17  ;;  %v2444_v16 = vpack.c.bf16 %v1283_v15, %v1282_v63 }
 0xeb7   :  { %1945 = vrcp.f32 %v1031_v19  ;;  %v1044_v31 = vand.u32 2147483648, %v1031_v19  ;;  %vm1038_vm9 = vweird.f32 %v1031_v19  ;;  %v1042_v32 = vand.u32 2147483647, %v1031_v19  ;;  %1296 = vmatpush.bf16.msra.mxu1 %v2444_v16  ;;  %1355 = vmatpush.bf16.msra.mxu3 %v2444_v16 }
 0xeb8   :  { %1947 = vpow2.f32 %v1809_v21  ;;  %1414 = vmatpush.bf16.msra.mxu0 %v2444_v16  ;;  %v1288_v21 = vld [vmem:[#allocation2] sm:$0x3] }
 0xeb9   :  { %v1045_v9 = vor.u32 1.1754944e-38, %v1044_v31  ;;  %vm1043_vm13 = vcmp.eq.f32.partialorder %v1042_v32, 8.507059e+37 }
 0xebb   :  { %1590 = vmatpush.bf16.msrb.mxu3 %v2441_v57 }
 0xebd   :  { %v1946_v20 = vpop.eup %1945 }
 0xebe   :  { %v1034_v22 = vmul.f32 %v1946_v20, %v1031_v19  ;;  %v1948_v26 = vpop.eup %1947  ;;  %vm1039_vm8 = vweird.f32 %v1946_v20 }
 0xebf   :  { %v1032_v27 = vadd.f32 1.0, %v1948_v26  ;;  %vm1040_vm12 = vmor %vm1038_vm9, %vm1039_vm8  ;;  %1591 = vmatpush.bf16.msrb.mxu3 %v2444_v16 }
 0xec0   :  { %v1035_v23 = vsub.f32 1.0, %v1034_v22 }
 0xec1   :  { %1949 = vrcp.f32 %v1032_v27  ;;  %v1059_v41 = vand.u32 2147483648, %v1032_v27  ;;  %vm1053_vm15 = vweird.f32 %v1032_v27  ;;  %v1057_v61 = vand.u32 2147483647, %v1032_v27 }
 0xec2   :  { %v1036_v25 = vmul.f32 %v1946_v20, %v1035_v23 }
 0xec3   :  { %v1060_v43 = vor.u32 1.1754944e-38, %v1059_v41  ;;  %vm1058_vm1 = vcmp.eq.f32.partialorder %v1057_v61, 8.507059e+37 }
 0xec4   :  { %v1037_v30 = vadd.f32 %v1946_v20, %v1036_v25 }
 0xec6   :  { %v1041_v6 = vsel %vm1040_vm12, %v1946_v20, %v1037_v30 }
 0xec7   :  { %v1046_v34 = vsel %vm1043_vm13, %v1045_v9, %v1041_v6  ;;  %v1950_v36 = vpop.eup %1949 }
 0xec8   :  { %v1049_v37 = vmul.f32 %v1950_v36, %v1032_v27  ;;  %vm1054_vm14 = vweird.f32 %v1950_v36  ;;  %v1071_v46 = vmul.f32 %v1067_v33, %v1046_v34 }
 0xec9   :  { %vm1055_vm0 = vmor %vm1053_vm15, %vm1054_vm14 }
 0xeca   :  { %v1050_v39 = vsub.f32 1.0, %v1049_v37 }
 0xecc   :  { %v1051_v28 = vmul.f32 %v1950_v36, %v1050_v39 }
 0xece   :  { %v1052_v60 = vadd.f32 %v1950_v36, %v1051_v28 }
 0xed0   :  { %v1056_v62 = vsel %vm1055_vm0, %v1950_v36, %v1052_v60 }
 0xed1   :  { %v1061_v45 = vsel %vm1058_vm1, %v1060_v43, %v1056_v62 }
 0xed2   :  { %v1072_v47 = vmul.f32 %v1068_v38, %v1061_v45 }
 0xf0d   :  { %v1076_v24 = vpop.permute.xlu2 %1075 }
 0xf0e   :  { %v1081_v35 = vmul.f32 %v1076_v24, %v1046_v34 }
 0xf10   :  { %1085 = vrot.lane.b32.xlu1 %v1081_v35, %s2119_s3 }
 0xf26   :  { %v1078_v44 = vpop.permute.xlu0 %1077 }
 0xf27   :  { %v1082_v40 = vmul.f32 %v1078_v44, %v1061_v45 }
 0xf29   :  { %1087 = vrot.lane.b32.xlu2 %v1082_v40, %s2119_s3 }
 0xf82   :  { %v1086_v48 = vpop.permute.xlu1 %1085 }
 0xf83   :  { %v1088_v49 = vpop.permute.xlu2 %1087  ;;  %v2430_v50 = vadd.f32 %v1086_v48, %v1071_v46 }
 0xf84   :  { %v2432_v51 = vadd.f32 %v1088_v49, %v1072_v47 }
 0xf85   :  { %1951 = vtanh.f32 %v2430_v50 }
 0xf86   :  { %1953 = vtanh.f32 %v2432_v51 }
 0xf8b   :  { %v1952_v52 = vpop.eup %1951 }
 0xf8c   :  { %v1954_v54 = vpop.eup %1953  ;;  %1097 = vrot.lane.b32.xlu0 %v1952_v52, %s2118_s0 }
 0xf8d   :  { %1099 = vrot.lane.b32.xlu1 %v1954_v54, %s2118_s0 }
 0xffe   :  { %v1098_v42 = vpop.permute.xlu0 %1097 }
 0xfff   :  { %v1100_v0 = vpop.permute.xlu1 %1099  ;;  %v1103_v7 = vmul.f32 %v1098_v42, %v1046_v34 }
0x1000   :  { %v1104_v56 = vmul.f32 %v1100_v0, %v1061_v45 }
0x1001   :  { %v1107_v8 = vrot.slane %v1103_v7, 6  ;;  %v1136_v12 = vpack.c.bf16 %v1103_v7, %v1103_v7 }
0x1002   :  { %v1108_v58 = vrot.slane %v1104_v56, 5  ;;  %v1137_v5 = vpack.c.bf16 %v1104_v56, %v1104_v56 }
0x1003   :  { %v1140_v55 = vunpack.c.l.b16 %v1136_v12 }
0x1004   :  { %v1141_v1 = vunpack.c.l.b16 %v1137_v5  ;;  %v1109_v2 = vsel %vm237_vm10, %v1108_v58, %v1107_v8 }
0x1005   :  { %v1142_v3 = vrot.slane %v1140_v55, 6  ;;  %1110 = vrot.lane.b32.xlu2 %v1109_v2, %s2119_s3 }
0x1006   :  { %v1143_v4 = vrot.slane %v1141_v1, 5 }
0x1008   :  { %v1144_v11 = vsel %vm237_vm10, %v1143_v4, %v1142_v3 }
0x1009   :  { %v1145_v41 = vpack.c.b16 %v1144_v11, %v1144_v11 }
0x105f   :  { %v1111_v17 = vpop.permute.xlu2 %1110 }
0x1060   :  { %1810 = vmatmul.msk.f32.vlgmr.msrb.gmra.mxu1 %vm134_vm11, %v1111_v17 }
0x1061   :  { %1531 = vmatpush.bf16.msrb.mxu1 %v2441_v57 }
0x1065   :  { %1532 = vmatpush.bf16.msrb.mxu1 %v2444_v16 }
0x1068   :  { %1297 = vmatmul.bf16.vlgmr.msra.gmra.mxu1 %v2117_v10 }
0x10dd   :  { %v1131_v19 = vpop.f32.mrf.mxu1 }
0x10de   :  { %v1132_v20 = vadd.f32 %v2329_v29, %v1131_v19 }
0x10e0   :  { %1135 = vst [vmem:[#allocation2 + $0xc] sm:$0x3] %v1132_v20 }
0x10e5   :  { %v1298_v22 = vpop.f32.mrf.mxu1 }
0x10e6   :  { %v1302_v23 = vadd.f32 %v1298_v22, %v1288_v21 }
0x10e8   :  { %1955 = vtanh.f32 %v1302_v23  ;;  %v1815_v27 = vmul.f32 -1.442695, %v1302_v23 }
0x10ea   :  { %1957 = vpow2.f32 %v1815_v27 }
0x10ed   :  { %v1300_v25 = vpop.f32.mrf.mxu1 }
0x10ee   :  { %v1956_v26 = vpop.eup %1955 }
0x10ef   :  { %1325 = vrot.lane.b32.xlu0 %v1956_v26, %s2118_s0 }
0x10f0   :  { %v1958_v30 = vpop.eup %1957 }
0x10f1   :  { %v1306_v31 = vadd.f32 1.0, %v1958_v30 }
0x10f3   :  { %1959 = vrcp.f32 %v1306_v31  ;;  %v1318_v34 = vand.u32 2147483648, %v1306_v31  ;;  %vm1312_vm3 = vweird.f32 %v1306_v31  ;;  %v1316_v35 = vand.u32 2147483647, %v1306_v31 }
0x10f5   :  { %v1319_v37 = vor.u32 1.1754944e-38, %v1318_v34  ;;  %vm1317_vm5 = vcmp.eq.f32.partialorder %v1316_v35, 8.507059e+37 }
0x10f7   :  { %964 = vrot.lane.b32.xlu0 %v2414_v53, %s2119_s3 }
0x10f9   :  { %v1960_v10 = vpop.eup %1959 }
0x10fa   :  { %v1308_v32 = vmul.f32 %v1960_v10, %v1306_v31  ;;  %vm1313_vm2 = vweird.f32 %v1960_v10 }
0x10fb   :  { %vm1314_vm4 = vmor %vm1312_vm3, %vm1313_vm2 }
0x10fc   :  { %v1309_v6 = vsub.f32 1.0, %v1308_v32 }
0x10fe   :  { %v1310_v9 = vmul.f32 %v1960_v10, %v1309_v6 }
0x1100   :  { %v1311_v24 = vadd.f32 %v1960_v10, %v1310_v9  ;;  %v1340_v9 = vld [vmem:[#allocation2 + $0x2] sm:$0x3] }
0x1102   :  { %v1315_v36 = vsel %vm1314_vm4, %v1960_v10, %v1311_v24 }
0x1103   :  { %v1320_v53 = vsel %vm1317_vm5, %v1319_v37, %v1315_v36  ;;  %v1213_v37 = vrot.slane %v2430_v50, 7 }
0x1104   :  { %v1323_v61 = vmul.f32 0.0, %v1320_v53 }
0x1161   :  { %v1326_v39 = vpop.permute.xlu0 %1325 }
0x1162   :  { %v1328_v28 = vmul.f32 %v1326_v39, %v1320_v53  ;;  %v1214_v39 = vrot.slane %v2432_v51, 7 }
0x1164   :  { %1330 = vrot.lane.b32.xlu1 %v1328_v28, %s2119_s3 }
0x1169   :  { %v965_v60 = vpop.permute.xlu0 %964 }
0x116a   :  { %1806 = vmatmul.msk.f32.vlgmr.msrb.gmra.mxu2 %vm134_vm11, %v965_v60 }
0x116b   :  { %1472 = vmatpush.bf16.msrb.mxu2 %v2441_v57 }
0x116c   :  { %1146 = vrot.lane.b32.xlu1 %v1145_v41, %s2119_s3 }
0x116f   :  { %1473 = vmatpush.bf16.msrb.mxu2 %v2444_v16 }
0x11d6   :  { %v1331_v62 = vpop.permute.xlu1 %1330 }
0x11d7   :  { %v2466_v43 = vadd.f32 %v1331_v62, %v1323_v61 }
0x11d9   :  { %1961 = vtanh.f32 %v2466_v43 }
0x11de   :  { %v1147_v44 = vpop.permute.xlu1 %1146 }
0x11df   :  { %v1962_v45 = vpop.eup %1961  ;;  %1811 = vmatmul.msk.bf16.vlgmr.msra.gmra.mxu2 %vm134_vm11, %v1147_v44 }
0x11e0   :  { %1336 = vrot.lane.b32.xlu2 %v1962_v45, %s2118_s0  ;;  %1708 = vmatpush.bf16.msra.mxu2 %v2441_v57 }
0x11e4   :  { %1709 = vmatpush.bf16.msra.mxu2 %v2444_v16 }
0x11ed   :  { %v985_v40 = vpop.f32.mrf.mxu2 }
0x11ee   :  { %v986_v33 = vadd.f32 %v2329_v29, %v985_v40 }
0x11f0   :  { %989 = vst [vmem:[#allocation2 + $0xa] sm:$0x3] %v986_v33 }
0x123a   :  { %v1337_v38 = vpop.permute.xlu2 %1336 }
0x123b   :  { %v1339_v46 = vmul.f32 %v1337_v38, %v1320_v53 }
0x123d   :  { %v1341_v47 = vpack.c.bf16 %v1339_v46, %v1339_v46 }
0x123f   :  { %1343 = vrot.lane.b32.xlu2 %v1341_v47, %s2119_s3 }
0x1262   :  { %v1160_v48 = vpop.f32.mrf.mxu2 }
0x1263   :  { %v1165_v49 = vrot.slane %v1160_v48, 1  ;;  %v1166_v52 = vrot.slane %v1160_v48, 2 }
0x1265   :  { %v1169_v54 = vadd.f32 %v1165_v49, %v2213_v18  ;;  %v1170_v42 = vadd.f32 %v1166_v52, %v2210_v14 }
0x1267   :  { %1963 = vtanh.f32 %v1169_v54  ;;  %v1812_v8 = vmul.f32 -1.442695, %v1169_v54  ;;  %v1813_v12 = vmul.f32 -1.442695, %v1170_v42 }
0x1268   :  { %1965 = vtanh.f32 %v1170_v42 }
0x1269   :  { %1967 = vpow2.f32 %v1812_v8 }
0x126a   :  { %v1162_v0 = vpop.f32.mrf.mxu2  ;;  %1969 = vpow2.f32 %v1813_v12 }
0x126d   :  { %v1964_v7 = vpop.eup %1963 }
0x126e   :  { %v1966_v56 = vpop.eup %1965  ;;  %1221 = vrot.lane.b32.xlu0 %v1964_v7, %s2118_s0 }
0x126f   :  { %1223 = vrot.lane.b32.xlu1 %v1966_v56, %s2118_s0  ;;  %v1968_v58 = vpop.eup %1967 }
0x1270   :  { %v1970_v18 = vpop.eup %1969  ;;  %v1177_v5 = vadd.f32 1.0, %v1968_v58 }
0x1271   :  { %v1178_v14 = vadd.f32 1.0, %v1970_v18 }
0x1272   :  { %1971 = vrcp.f32 %v1177_v5  ;;  %v1190_v17 = vand.u32 2147483648, %v1177_v5  ;;  %vm1184_vm8 = vweird.f32 %v1177_v5  ;;  %v1188_v20 = vand.u32 2147483647, %v1177_v5 }
0x1273   :  { %1973 = vrcp.f32 %v1178_v14  ;;  %v1205_v19 = vand.u32 2147483648, %v1178_v14  ;;  %vm1199_vm9 = vweird.f32 %v1178_v14  ;;  %v1203_v21 = vand.u32 2147483647, %v1178_v14 }
0x1274   :  { %v1191_v25 = vor.u32 1.1754944e-38, %v1190_v17  ;;  %vm1189_vm14 = vcmp.eq.f32.partialorder %v1188_v20, 8.507059e+37 }
0x1275   :  { %v1206_v26 = vor.u32 1.1754944e-38, %v1205_v19  ;;  %vm1204_vm15 = vcmp.eq.f32.partialorder %v1203_v21, 8.507059e+37  ;;  %v1399_v19 = vld [vmem:[#allocation2 + $0x4] sm:$0x3] }
0x1278   :  { %v1972_v55 = vpop.eup %1971 }
0x1279   :  { %v1974_v1 = vpop.eup %1973  ;;  %v1180_v2 = vmul.f32 %v1972_v55, %v1177_v5  ;;  %vm1185_vm6 = vweird.f32 %v1972_v55 }
0x127a   :  { %v1195_v3 = vmul.f32 %v1974_v1, %v1178_v14  ;;  %vm1200_vm7 = vweird.f32 %v1974_v1  ;;  %vm1186_vm12 = vmor %vm1184_vm8, %vm1185_vm6 }
0x127b   :  { %v1181_v4 = vsub.f32 1.0, %v1180_v2  ;;  %vm1201_vm13 = vmor %vm1199_vm9, %vm1200_vm7 }
0x127c   :  { %v1196_v11 = vsub.f32 1.0, %v1195_v3 }
0x127d   :  { %v1182_v59 = vmul.f32 %v1972_v55, %v1181_v4 }
0x127e   :  { %v1197_v13 = vmul.f32 %v1974_v1, %v1196_v11 }
0x127f   :  { %v1183_v63 = vadd.f32 %v1972_v55, %v1182_v59 }
0x1280   :  { %v1198_v15 = vadd.f32 %v1974_v1, %v1197_v13 }
0x1281   :  { %v1187_v22 = vsel %vm1186_vm12, %v1972_v55, %v1183_v63 }
0x1282   :  { %v1202_v23 = vsel %vm1201_vm13, %v1974_v1, %v1198_v15  ;;  %v1192_v30 = vsel %vm1189_vm14, %v1191_v25, %v1187_v22  ;;  %v2035_v15 = vld [vmem:[%s2541_s6] ss:$0 sm:$0xff] }
0x1283   :  { %v1207_v10 = vsel %vm1204_vm15, %v1206_v26, %v1202_v23  ;;  %v1217_v28 = vmul.f32 %v1213_v37, %v1192_v30 }
0x1284   :  { %v1218_v60 = vmul.f32 %v1214_v39, %v1207_v10 }
0x1299   :  { %v1344_v29 = vpop.permute.xlu2 %1343 }
0x129a   :  { %1816 = vmatmul.msk.bf16.vlgmr.msra.gmra.mxu3 %vm134_vm11, %v1344_v29 }
0x12e0   :  { %v1222_v27 = vpop.permute.xlu0 %1221 }
0x12e1   :  { %v1224_v31 = vpop.permute.xlu1 %1223  ;;  %v1227_v32 = vmul.f32 %v1222_v27, %v1192_v30 }
0x12e2   :  { %v1228_v6 = vmul.f32 %v1224_v31, %v1207_v10 }
0x12e3   :  { %1231 = vrot.lane.b32.xlu0 %v1227_v32, %s2119_s3 }
0x12e4   :  { %1233 = vrot.lane.b32.xlu1 %v1228_v6, %s2119_s3 }
0x131d   :  { %v1357_v24 = vpop.f32.mrf.mxu3 }
0x131e   :  { %v1361_v34 = vadd.f32 %v1357_v24, %v1340_v9 }
0x1320   :  { %1975 = vtanh.f32 %v1361_v34  ;;  %v1817_v53 = vmul.f32 -1.442695, %v1361_v34 }
0x1322   :  { %1977 = vpow2.f32 %v1817_v53 }
0x1325   :  { %v1359_v35 = vpop.f32.mrf.mxu3 }
0x1326   :  { %v1976_v36 = vpop.eup %1975 }
0x1327   :  { %1384 = vrot.lane.b32.xlu2 %v1976_v36, %s2118_s0 }
0x1328   :  { %v1978_v45 = vpop.eup %1977 }
0x1329   :  { %v1365_v50 = vadd.f32 1.0, %v1978_v45 }
0x132b   :  { %v1377_v49 = vand.u32 2147483648, %v1365_v50  ;;  %vm1371_vm1 = vweird.f32 %v1365_v50  ;;  %v1375_v52 = vand.u32 2147483647, %v1365_v50 }
0x132d   :  { %v1378_v42 = vor.u32 1.1754944e-38, %v1377_v49  ;;  %vm1376_vm3 = vcmp.eq.f32.partialorder %v1375_v52, 8.507059e+37 }
0x1355   :  { %v1232_v41 = vpop.permute.xlu0 %1231 }
0x1356   :  { %v1234_v61 = vpop.permute.xlu1 %1233  ;;  %v1237_v62 = vadd.f32 %v1232_v41, %v1217_v28 }
0x1357   :  { %v1238_v44 = vadd.f32 %v1234_v61, %v1218_v60 }
0x1358   :  { %1979 = vtanh.f32 %v1237_v62 }
0x1359   :  { %1981 = vtanh.f32 %v1238_v44  ;;  %v1458_v44 = vld [vmem:[#allocation2 + $0x6] sm:$0x3] }
0x135a   :  { %1983 = vrcp.f32 %v1365_v50 }
0x135e   :  { %v1980_v40 = vpop.eup %1979 }
0x135f   :  { %v1982_v33 = vpop.eup %1981  ;;  %1243 = vrot.lane.b32.xlu0 %v1980_v40, %s2118_s0 }
0x1360   :  { %1245 = vrot.lane.b32.xlu1 %v1982_v33, %s2118_s0  ;;  %v1984_v51 = vpop.eup %1983 }
0x1361   :  { %v1367_v38 = vmul.f32 %v1984_v51, %v1365_v50  ;;  %vm1372_vm0 = vweird.f32 %v1984_v51 }
0x1362   :  { %vm1373_vm2 = vmor %vm1371_vm1, %vm1372_vm0 }
0x1363   :  { %v1368_v46 = vsub.f32 1.0, %v1367_v38 }
0x1365   :  { %v1369_v47 = vmul.f32 %v1984_v51, %v1368_v46 }
0x1367   :  { %v1370_v48 = vadd.f32 %v1984_v51, %v1369_v47 }
0x1369   :  { %v1374_v54 = vsel %vm1373_vm2, %v1984_v51, %v1370_v48 }
0x136a   :  { %v1379_v7 = vsel %vm1376_vm3, %v1378_v42, %v1374_v54 }
0x136b   :  { %v1382_v55 = vmul.f32 %v1379_v7, %v2466_v43 }
0x1381   :  { %v1385_v0 = vpop.permute.xlu2 %1384 }
0x1382   :  { %v1387_v56 = vmul.f32 %v1385_v0, %v1379_v7 }
0x1384   :  { %1389 = vrot.lane.b32.xlu2 %v1387_v56, %s2119_s3 }
0x13d1   :  { %v1244_v29 = vpop.permute.xlu0 %1243 }
0x13d2   :  { %v1246_v8 = vpop.permute.xlu1 %1245  ;;  %v1249_v12 = vmul.f32 %v1244_v29, %v1192_v30 }
0x13d3   :  { %v1250_v58 = vmul.f32 %v1246_v8, %v1207_v10 }
0x13d4   :  { %v1253_v18 = vrot.slane %v1249_v12, 7 }
0x13d5   :  { %v1254_v5 = vrot.slane %v1250_v58, 6 }
0x13d7   :  { %v1255_v14 = vsel %vm237_vm10, %v1254_v5, %v1253_v18 }
0x13d8   :  { %1256 = vrot.lane.b32.xlu0 %v1255_v14, %s2119_s3 }
0x13de   :  { %v1390_v1 = vpop.permute.xlu2 %1389 }
0x13df   :  { %v1392_v2 = vadd.f32 %v1390_v1, %v1382_v55 }
0x13e1   :  { %1985 = vtanh.f32 %v1392_v2 }
0x13e7   :  { %v1986_v3 = vpop.eup %1985 }
0x13e8   :  { %1395 = vrot.lane.b32.xlu2 %v1986_v3, %s2118_s0 }
0x1442   :  { %v1396_v4 = vpop.permute.xlu2 %1395 }
0x1443   :  { %v1398_v11 = vmul.f32 %v1396_v4, %v1379_v7  ;;  %v1517_v4 = vld [vmem:[#allocation2 + $0x8] sm:$0x3] }
0x1445   :  { %v1400_v59 = vpack.c.bf16 %v1398_v11, %v1398_v11 }
0x1447   :  { %1402 = vrot.lane.b32.xlu1 %v1400_v59, %s2119_s3 }
0x144a   :  { %v1257_v13 = vpop.permute.xlu0 %1256 }
0x144b   :  { %1814 = vmatmul.msk.f32.vlgmr.msrb.gmra.mxu0 %vm134_vm11, %v1257_v13 }
0x144c   :  { %1649 = vmatpush.bf16.msrb.mxu0 %v2441_v57 }
0x1450   :  { %1650 = vmatpush.bf16.msrb.mxu0 %v2444_v16 }
0x14b9   :  { %v1403_v63 = vpop.permute.xlu1 %1402 }
0x14ba   :  { %1818 = vmatmul.msk.bf16.vlgmr.msra.gmra.mxu0 %vm134_vm11, %v1403_v63 }
0x14c8   :  { %v1277_v43 = vpop.f32.mrf.mxu0 }
0x14c9   :  { %v1278_v17 = vadd.f32 %v2035_v15, %v1277_v43 }
0x14cb   :  { %1281 = vst [vmem:[#allocation2 + $0xe] sm:$0x3] %v1278_v17 }
0x1537   :  { %v1416_v20 = vpop.f32.mrf.mxu0 }
0x1538   :  { %v1420_v21 = vadd.f32 %v1416_v20, %v1399_v19 }
0x153a   :  { %1987 = vtanh.f32 %v1420_v21  ;;  %v1819_v57 = vmul.f32 -1.442695, %v1420_v21 }
0x153c   :  { %1989 = vpow2.f32 %v1819_v57 }
0x153f   :  { %v1418_v22 = vpop.f32.mrf.mxu0 }
0x1540   :  { %v1988_v23 = vpop.eup %1987 }
0x1541   :  { %1443 = vrot.lane.b32.xlu2 %v1988_v23, %s2118_s0 }
0x1542   :  { %v1990_v16 = vpop.eup %1989 }
0x1543   :  { %v1424_v25 = vadd.f32 1.0, %v1990_v16 }
0x1545   :  { %1991 = vrcp.f32 %v1424_v25  ;;  %v1436_v32 = vand.u32 2147483648, %v1424_v25  ;;  %vm1430_vm4 = vweird.f32 %v1424_v25  ;;  %v1434_v6 = vand.u32 2147483647, %v1424_v25 }
0x1547   :  { %v1437_v24 = vor.u32 1.1754944e-38, %v1436_v32  ;;  %vm1435_vm6 = vcmp.eq.f32.partialorder %v1434_v6, 8.507059e+37 }
0x154b   :  { %v1992_v26 = vpop.eup %1991 }
0x154c   :  { %v1426_v27 = vmul.f32 %v1992_v26, %v1424_v25  ;;  %vm1431_vm10 = vweird.f32 %v1992_v26 }
0x154d   :  { %vm1432_vm5 = vmor %vm1430_vm4, %vm1431_vm10 }
0x154e   :  { %v1427_v30 = vsub.f32 1.0, %v1426_v27 }
0x1550   :  { %v1428_v31 = vmul.f32 %v1992_v26, %v1427_v30 }
0x1552   :  { %v1429_v10 = vadd.f32 %v1992_v26, %v1428_v31 }
0x1554   :  { %v1433_v9 = vsel %vm1432_vm5, %v1992_v26, %v1429_v10 }
0x1555   :  { %v1438_v35 = vsel %vm1435_vm6, %v1437_v24, %v1433_v9 }
0x1556   :  { %v1441_v37 = vmul.f32 %v1438_v35, %v1392_v2 }
0x159b   :  { %v1444_v34 = vpop.permute.xlu2 %1443 }
0x159c   :  { %v1446_v36 = vmul.f32 %v1444_v34, %v1438_v35 }
0x159e   :  { %1448 = vrot.lane.b32.xlu0 %v1446_v36, %s2119_s3 }
0x1610   :  { %v1449_v39 = vpop.permute.xlu0 %1448 }
0x1611   :  { %v1451_v53 = vadd.f32 %v1449_v39, %v1441_v37  ;;  %v1576_v37 = vld [vmem:[#allocation2 + $0xa] sm:$0x3] }
0x1613   :  { %1993 = vtanh.f32 %v1451_v53 }
0x1619   :  { %v1994_v28 = vpop.eup %1993 }
0x161a   :  { %1454 = vrot.lane.b32.xlu1 %v1994_v28, %s2118_s0 }
0x168c   :  { %v1455_v60 = vpop.permute.xlu1 %1454 }
0x168d   :  { %v1457_v41 = vmul.f32 %v1455_v60, %v1438_v35 }
0x168f   :  { %v1459_v61 = vpack.c.bf16 %v1457_v41, %v1457_v41 }
0x1691   :  { %1461 = vrot.lane.b32.xlu2 %v1459_v61, %s2119_s3 }
0x16eb   :  { %v1462_v62 = vpop.permute.xlu2 %1461 }
0x16ec   :  { %1820 = vmatmul.msk.bf16.vlgmr.msrb.gmra.mxu2 %vm134_vm11, %v1462_v62 }
0x176f   :  { %v1475_v45 = vpop.f32.mrf.mxu2 }
0x1770   :  { %v1479_v40 = vadd.f32 %v1475_v45, %v1458_v44 }
0x1772   :  { %1995 = vtanh.f32 %v1479_v40  ;;  %v1821_v51 = vmul.f32 -1.442695, %v1479_v40 }
0x1774   :  { %1997 = vpow2.f32 %v1821_v51 }
0x1777   :  { %v1477_v33 = vpop.f32.mrf.mxu2 }
0x1778   :  { %v1996_v50 = vpop.eup %1995 }
0x1779   :  { %1502 = vrot.lane.b32.xlu0 %v1996_v50, %s2118_s0 }
0x177a   :  { %v1998_v38 = vpop.eup %1997 }
0x177b   :  { %v1483_v46 = vadd.f32 1.0, %v1998_v38 }
0x177d   :  { %1999 = vrcp.f32 %v1483_v46  ;;  %v1495_v42 = vand.u32 2147483648, %v1483_v46  ;;  %vm1489_vm8 = vweird.f32 %v1483_v46  ;;  %v1493_v0 = vand.u32 2147483647, %v1483_v46 }
0x177f   :  { %v1496_v56 = vor.u32 1.1754944e-38, %v1495_v42  ;;  %vm1494_vm12 = vcmp.eq.f32.partialorder %v1493_v0, 8.507059e+37 }
0x1783   :  { %v2000_v47 = vpop.eup %1999 }
0x1784   :  { %v1485_v48 = vmul.f32 %v2000_v47, %v1483_v46  ;;  %vm1490_vm7 = vweird.f32 %v2000_v47 }
0x1785   :  { %vm1491_vm9 = vmor %vm1489_vm8, %vm1490_vm7 }
0x1786   :  { %v1486_v49 = vsub.f32 1.0, %v1485_v48 }
0x1788   :  { %v1487_v52 = vmul.f32 %v2000_v47, %v1486_v49 }
0x178a   :  { %v1488_v54 = vadd.f32 %v2000_v47, %v1487_v52 }
0x178c   :  { %v1492_v7 = vsel %vm1491_vm9, %v2000_v47, %v1488_v54 }
0x178d   :  { %v1497_v8 = vsel %vm1494_vm12, %v1496_v56, %v1492_v7 }
0x178e   :  { %v1500_v58 = vmul.f32 %v1497_v8, %v1451_v53 }
0x17eb   :  { %v1503_v29 = vpop.permute.xlu0 %1502 }
0x17ec   :  { %v1505_v12 = vmul.f32 %v1503_v29, %v1497_v8 }
0x17ee   :  { %1507 = vrot.lane.b32.xlu1 %v1505_v12, %s2119_s3 }
0x1860   :  { %v1508_v18 = vpop.permute.xlu1 %1507 }
0x1861   :  { %v1510_v5 = vadd.f32 %v1508_v18, %v1500_v58  ;;  %v1635_v58 = vld [vmem:[#allocation2 + $0xc] sm:$0x3] }
0x1863   :  { %2001 = vtanh.f32 %v1510_v5 }
0x1869   :  { %v2002_v14 = vpop.eup %2001 }
0x186a   :  { %1513 = vrot.lane.b32.xlu2 %v2002_v14, %s2118_s0 }
0x18c4   :  { %v1514_v55 = vpop.permute.xlu2 %1513 }
0x18c5   :  { %v1516_v1 = vmul.f32 %v1514_v55, %v1497_v8 }
0x18c7   :  { %v1518_v2 = vpack.c.bf16 %v1516_v1, %v1516_v1 }
0x18c9   :  { %1520 = vrot.lane.b32.xlu0 %v1518_v2, %s2119_s3 }
0x193b   :  { %v1521_v3 = vpop.permute.xlu0 %1520 }
0x193c   :  { %1822 = vmatmul.msk.bf16.vlgmr.msrb.gmra.mxu1 %vm134_vm11, %v1521_v3 }
0x19b9   :  { %v1534_v11 = vpop.f32.mrf.mxu1 }
0x19ba   :  { %v1538_v59 = vadd.f32 %v1534_v11, %v1517_v4 }
0x19bc   :  { %2003 = vtanh.f32 %v1538_v59  ;;  %v1823_v43 = vmul.f32 -1.442695, %v1538_v59 }
0x19be   :  { %2005 = vpow2.f32 %v1823_v43 }
0x19c1   :  { %v1536_v13 = vpop.f32.mrf.mxu1 }
0x19c2   :  { %v2004_v63 = vpop.eup %2003 }
0x19c3   :  { %1561 = vrot.lane.b32.xlu1 %v2004_v63, %s2118_s0 }
0x19c4   :  { %v2006_v15 = vpop.eup %2005 }
0x19c5   :  { %v1542_v17 = vadd.f32 1.0, %v2006_v15 }
0x19c7   :  { %2007 = vrcp.f32 %v1542_v17  ;;  %v1554_v57 = vand.u32 2147483648, %v1542_v17  ;;  %vm1548_vm14 = vweird.f32 %v1542_v17  ;;  %v1552_v16 = vand.u32 2147483647, %v1542_v17 }
0x19c9   :  { %v1555_v26 = vor.u32 1.1754944e-38, %v1554_v57  ;;  %vm1553_vm0 = vcmp.eq.f32.partialorder %v1552_v16, 8.507059e+37 }
0x19cd   :  { %v2008_v19 = vpop.eup %2007 }
0x19ce   :  { %v1544_v20 = vmul.f32 %v2008_v19, %v1542_v17  ;;  %vm1549_vm13 = vweird.f32 %v2008_v19 }
0x19cf   :  { %vm1550_vm15 = vmor %vm1548_vm14, %vm1549_vm13  ;;  %vm1765_vm13 = vcmask 254976   ;;  %vm1773_vm14 = vcmask 1024  }
0x19d0   :  { %v1545_v21 = vsub.f32 1.0, %v1544_v20 }
0x19d2   :  { %v1546_v22 = vmul.f32 %v2008_v19, %v1545_v21 }
0x19d4   :  { %v1547_v23 = vadd.f32 %v2008_v19, %v1546_v22 }
0x19d6   :  { %v1551_v25 = vsel %vm1550_vm15, %v2008_v19, %v1547_v23 }
0x19d7   :  { %v1556_v30 = vsel %vm1553_vm0, %v1555_v26, %v1551_v25 }
0x19d8   :  { %v1559_v10 = vmul.f32 %v1556_v30, %v1510_v5 }
0x1a35   :  { %v1562_v27 = vpop.permute.xlu1 %1561 }
0x1a36   :  { %v1564_v31 = vmul.f32 %v1562_v27, %v1556_v30 }
0x1a38   :  { %1566 = vrot.lane.b32.xlu2 %v1564_v31, %s2119_s3 }
0x1a92   :  { %v1567_v32 = vpop.permute.xlu2 %1566 }
0x1a93   :  { %v1569_v6 = vadd.f32 %v1567_v32, %v1559_v10  ;;  %v1694_v10 = vld [vmem:[#allocation2 + $0xe] sm:$0x3] }
0x1a95   :  { %2009 = vtanh.f32 %v1569_v6 }
0x1a9b   :  { %v2010_v9 = vpop.eup %2009 }
0x1a9c   :  { %1572 = vrot.lane.b32.xlu0 %v2010_v9, %s2118_s0 }
0x1b0e   :  { %v1573_v24 = vpop.permute.xlu0 %1572 }
0x1b0f   :  { %v1575_v34 = vmul.f32 %v1573_v24, %v1556_v30 }
0x1b11   :  { %v1577_v35 = vpack.c.bf16 %v1575_v34, %v1575_v34 }
0x1b13   :  { %1579 = vrot.lane.b32.xlu1 %v1577_v35, %s2119_s3 }
0x1b85   :  { %v1580_v36 = vpop.permute.xlu1 %1579 }
0x1b86   :  { %1824 = vmatmul.msk.bf16.vlgmr.msrb.gmra.mxu3 %vm134_vm11, %v1580_v36 }
0x1c09   :  { %v1593_v39 = vpop.f32.mrf.mxu3 }
0x1c0a   :  { %v1597_v53 = vadd.f32 %v1593_v39, %v1576_v37 }
0x1c0c   :  { %2011 = vtanh.f32 %v1597_v53  ;;  %v1825_v41 = vmul.f32 -1.442695, %v1597_v53 }
0x1c0e   :  { %2013 = vpow2.f32 %v1825_v41 }
0x1c11   :  { %v1595_v28 = vpop.f32.mrf.mxu3 }
0x1c12   :  { %v2012_v60 = vpop.eup %2011 }
0x1c13   :  { %1620 = vrot.lane.b32.xlu2 %v2012_v60, %s2118_s0 }
0x1c14   :  { %v2014_v61 = vpop.eup %2013 }
0x1c15   :  { %v1601_v62 = vadd.f32 1.0, %v2014_v61 }
0x1c17   :  { %2015 = vrcp.f32 %v1601_v62  ;;  %v1613_v51 = vand.u32 2147483648, %v1601_v62  ;;  %vm1607_vm2 = vweird.f32 %v1601_v62  ;;  %v1611_v38 = vand.u32 2147483647, %v1601_v62 }
0x1c19   :  { %v1614_v47 = vor.u32 1.1754944e-38, %v1613_v51  ;;  %vm1612_vm10 = vcmp.eq.f32.partialorder %v1611_v38, 8.507059e+37 }
0x1c1d   :  { %v2016_v44 = vpop.eup %2015 }
0x1c1e   :  { %v1603_v45 = vmul.f32 %v2016_v44, %v1601_v62  ;;  %vm1608_vm1 = vweird.f32 %v2016_v44 }
0x1c1f   :  { %vm1609_vm3 = vmor %vm1607_vm2, %vm1608_vm1 }
0x1c20   :  { %v1604_v40 = vsub.f32 1.0, %v1603_v45 }
0x1c22   :  { %v1605_v33 = vmul.f32 %v2016_v44, %v1604_v40 }
0x1c24   :  { %v1606_v50 = vadd.f32 %v2016_v44, %v1605_v33 }
0x1c26   :  { %v1610_v46 = vsel %vm1609_vm3, %v2016_v44, %v1606_v50  ;;  %v1841_v50 = vld [vmem:[%s2542_s7] ss:$0 sm:$0xff] }
0x1c27   :  { %v1615_v49 = vsel %vm1612_vm10, %v1614_v47, %v1610_v46 }
0x1c28   :  { %v1618_v54 = vmul.f32 %v1615_v49, %v1569_v6 }
0x1c6d   :  { %v1621_v48 = vpop.permute.xlu2 %1620 }
0x1c6e   :  { %v1623_v52 = vmul.f32 %v1621_v48, %v1615_v49 }
0x1c70   :  { %1625 = vrot.lane.b32.xlu0 %v1623_v52, %s2119_s3 }
0x1ce2   :  { %v1626_v42 = vpop.permute.xlu0 %1625 }
0x1ce3   :  { %v1628_v0 = vadd.f32 %v1626_v42, %v1618_v54 }
0x1ce5   :  { %2017 = vtanh.f32 %v1628_v0 }
0x1ceb   :  { %v2018_v7 = vpop.eup %2017 }
0x1cec   :  { %1631 = vrot.lane.b32.xlu1 %v2018_v7, %s2118_s0  ;;  %v1842_v7 = vld [vmem:[#allocation3] ss:$0 sm:$0xff] }
0x1d5e   :  { %v1632_v56 = vpop.permute.xlu1 %1631 }
0x1d5f   :  { %v1634_v29 = vmul.f32 %v1632_v56, %v1615_v49 }
0x1d61   :  { %v1636_v8 = vpack.c.bf16 %v1634_v29, %v1634_v29 }
0x1d63   :  { %1638 = vrot.lane.b32.xlu2 %v1636_v8, %s2119_s3 }
0x1dbd   :  { %v1639_v12 = vpop.permute.xlu2 %1638 }
0x1dbe   :  { %1826 = vmatmul.msk.bf16.vlgmr.msrb.gmra.mxu0 %vm134_vm11, %v1639_v12 }
0x1e3b   :  { %v1652_v18 = vpop.f32.mrf.mxu0 }
0x1e3c   :  { %v1656_v5 = vadd.f32 %v1652_v18, %v1635_v58 }
0x1e3e   :  { %2019 = vtanh.f32 %v1656_v5  ;;  %v1827_v1 = vmul.f32 -1.442695, %v1656_v5 }
0x1e40   :  { %2021 = vpow2.f32 %v1827_v1 }
0x1e43   :  { %v1654_v14 = vpop.f32.mrf.mxu0 }
0x1e44   :  { %v2020_v55 = vpop.eup %2019 }
0x1e45   :  { %1679 = vrot.lane.b32.xlu0 %v2020_v55, %s2118_s0 }
0x1e46   :  { %v2022_v2 = vpop.eup %2021 }
0x1e47   :  { %v1660_v3 = vadd.f32 1.0, %v2022_v2 }
0x1e49   :  { %2023 = vrcp.f32 %v1660_v3  ;;  %v1672_v43 = vand.u32 2147483648, %v1660_v3  ;;  %vm1666_vm5 = vweird.f32 %v1660_v3  ;;  %v1670_v15 = vand.u32 2147483647, %v1660_v3 }
0x1e4b   :  { %v1673_v19 = vor.u32 1.1754944e-38, %v1672_v43  ;;  %vm1671_vm7 = vcmp.eq.f32.partialorder %v1670_v15, 8.507059e+37 }
0x1e4f   :  { %v2024_v4 = vpop.eup %2023 }
0x1e50   :  { %v1662_v11 = vmul.f32 %v2024_v4, %v1660_v3  ;;  %vm1667_vm4 = vweird.f32 %v2024_v4 }
0x1e51   :  { %vm1668_vm6 = vmor %vm1666_vm5, %vm1667_vm4 }
0x1e52   :  { %v1663_v59 = vsub.f32 1.0, %v1662_v11 }
0x1e54   :  { %v1664_v13 = vmul.f32 %v2024_v4, %v1663_v59 }
0x1e56   :  { %v1665_v63 = vadd.f32 %v2024_v4, %v1664_v13 }
0x1e58   :  { %v1669_v17 = vsel %vm1668_vm6, %v2024_v4, %v1665_v63 }
0x1e59   :  { %v1674_v21 = vsel %vm1671_vm7, %v1673_v19, %v1669_v17 }
0x1e5a   :  { %v1677_v23 = vmul.f32 %v1674_v21, %v1628_v0 }
0x1eb7   :  { %v1680_v20 = vpop.permute.xlu0 %1679 }
0x1eb8   :  { %v1682_v22 = vmul.f32 %v1680_v20, %v1674_v21 }
0x1eba   :  { %1684 = vrot.lane.b32.xlu1 %v1682_v22, %s2119_s3 }
0x1f2c   :  { %v1685_v57 = vpop.permute.xlu1 %1684 }
0x1f2d   :  { %v1687_v16 = vadd.f32 %v1685_v57, %v1677_v23 }
0x1f2f   :  { %2025 = vtanh.f32 %v1687_v16 }
0x1f35   :  { %v2026_v25 = vpop.eup %2025 }
0x1f36   :  { %1690 = vrot.lane.b32.xlu2 %v2026_v25, %s2118_s0 }
0x1f90   :  { %v1691_v26 = vpop.permute.xlu2 %1690 }
0x1f91   :  { %v1693_v27 = vmul.f32 %v1691_v26, %v1674_v21 }
0x1f93   :  { %v1695_v30 = vpack.c.bf16 %v1693_v27, %v1693_v27 }
0x1f95   :  { %1697 = vrot.lane.b32.xlu0 %v1695_v30, %s2119_s3 }
0x2007   :  { %v1698_v31 = vpop.permute.xlu0 %1697 }
0x2008   :  { %1828 = vmatmul.msk.bf16.vlgmr.msra.gmra.mxu2 %vm134_vm11, %v1698_v31 }
0x208b   :  { %v1711_v32 = vpop.f32.mrf.mxu2 }
0x208c   :  { %v1715_v6 = vadd.f32 %v1711_v32, %v1694_v10 }
0x208e   :  { %2027 = vtanh.f32 %v1715_v6  ;;  %v1829_v34 = vmul.f32 -1.442695, %v1715_v6 }
0x2090   :  { %2029 = vpow2.f32 %v1829_v34 }
0x2093   :  { %v1713_v9 = vpop.f32.mrf.mxu2 }
0x2094   :  { %v2028_v24 = vpop.eup %2027 }
0x2095   :  { %1738 = vrot.lane.b32.xlu1 %v2028_v24, %s2118_s0 }
0x2096   :  { %v2030_v35 = vpop.eup %2029 }
0x2097   :  { %v1719_v36 = vadd.f32 1.0, %v2030_v35 }
0x2099   :  { %2031 = vrcp.f32 %v1719_v36  ;;  %v1731_v41 = vand.u32 2147483648, %v1719_v36  ;;  %vm1725_vm11 = vweird.f32 %v1719_v36  ;;  %v1729_v61 = vand.u32 2147483647, %v1719_v36 }
0x209b   :  { %v1732_v44 = vor.u32 1.1754944e-38, %v1731_v41  ;;  %vm1730_vm12 = vcmp.eq.f32.partialorder %v1729_v61, 8.507059e+37 }
0x209d   :  { %1757 = vrot.lane.b32.xlu1 %v1841_v50, %s2120_s15 }
0x209f   :  { %v2032_v37 = vpop.eup %2031 }
0x20a0   :  { %v1721_v39 = vmul.f32 %v2032_v37, %v1719_v36  ;;  %vm1726_vm8 = vweird.f32 %v2032_v37 }
0x20a1   :  { %vm1727_vm9 = vmor %vm1725_vm11, %vm1726_vm8 }
0x20a2   :  { %v1722_v53 = vsub.f32 1.0, %v1721_v39 }
0x20a4   :  { %v1723_v28 = vmul.f32 %v2032_v37, %v1722_v53 }
0x20a6   :  { %v1724_v60 = vadd.f32 %v2032_v37, %v1723_v28 }
0x20a8   :  { %v1728_v62 = vsel %vm1727_vm9, %v2032_v37, %v1724_v60 }
0x20a9   :  { %v1733_v40 = vsel %vm1730_vm12, %v1732_v44, %v1728_v62 }
0x20aa   :  { %v1736_v51 = vmul.f32 %v1733_v40, %v1687_v16 }
0x2107   :  { %v1739_v45 = vpop.permute.xlu1 %1738 }
0x2108   :  { %v1741_v33 = vmul.f32 %v1739_v45, %v1733_v40 }
0x210a   :  { %1743 = vrot.lane.b32.xlu2 %v1741_v33, %s2119_s3 }
0x210f   :  { %v1758_v49 = vpop.permute.xlu1 %1757 }
0x2164   :  { %v1744_v38 = vpop.permute.xlu2 %1743 }
0x2165   :  { %v1746_v46 = vadd.f32 %v1744_v38, %v1736_v51 }
0x2167   :  { %2033 = vtanh.f32 %v1746_v46 }
0x216d   :  { %v2034_v47 = vpop.eup %2033 }
0x216e   :  { %1749 = vrot.lane.b32.xlu0 %v2034_v47, %s2118_s0 }
0x21e0   :  { %v1750_v48 = vpop.permute.xlu0 %1749 }
0x21e1   :  { %v1752_v52 = vmul.f32 %v1750_v48, %v1733_v40 }
0x21e3   :  { %v1760_v54 = vmul.f32 %v1758_v49, %v1752_v52 }
0x21e5   :  { %1762 = vrot.lane.b32.xlu2 %v1760_v54, %s2119_s3 }
0x223f   :  { %v1763_v42 = vpop.permute.xlu2 %1762 }
0x2240   :  { %v1766_v0 = vsel %vm1765_vm13, %v1763_v42, 0.0 }
0x2241   :  { %1767 = vadd.xlane.f32.xlu0 %v1766_v0 }
0x22b4   :  { %v1768_v56 = vpop.xlane.xlu0 %1767 }
0x22b5   :  { %v1772_v29 = vadd.f32 %v1842_v7, %v1768_v56 }
0x22b7   :  { %1774 = vst.msk [vmem:[%s2544_s9] sm:$0x3] %vm1773_vm14, %v1772_v29 }
0x22b8   :  { %1779 = vsyncpa [#allocation5], 1 }
0x22b9   :  { %1780 = vsyncpa [#allocation7], 1 }

</bundles_post_ra>
